<compile_context>
chip_gen: v5e
topology: v5e:2x2
jax: 0.10.0
libtpu: 0.0.40
codegen_flags: <defaults>
</compile_context>

<pallas_src>
import jax
import jax.numpy as jnp
from jax.experimental import pallas as pl
from jax.experimental.pallas import tpu as pltpu

EPS = 1e-5


def scorenet_kernel(u_ref, v_ref,
                    w2_ref, s2_ref, t2_ref,
                    w3_ref, s3_ref, t3_ref,
                    w4_ref, b4_ref,
                    o_ref):
    ti = u_ref.shape[1]
    tj = v_ref.shape[1]

    u = u_ref[0]                                   # (TI, 256) f32, BN scale folded in
    v = v_ref[0]                                   # (TJ, 256) f32, BN shift + bias folded in

    # Layer 1: pairwise broadcast-add + ReLU (the matmul was done per-point in the wrapper).
    h1 = jnp.maximum(u[:, None, :] + v[None, :, :], 0.0)          # (TI, TJ, 256) f32
    h1 = h1.reshape(ti * tj, u.shape[-1]).astype(jnp.bfloat16)

    # Layer 2: 256 -> 128 on the MXU (bf16 operands, f32 accumulate), folded BN, ReLU.
    h2 = jnp.dot(h1, w2_ref[...], preferred_element_type=jnp.float32)
    h2 = jnp.maximum(h2 * s2_ref[...] + t2_ref[...], 0.0).astype(jnp.bfloat16)

    # Layer 3: 128 -> 64.
    h3 = jnp.dot(h2, w3_ref[...], preferred_element_type=jnp.float32)
    h3 = jnp.maximum(h3 * s3_ref[...] + t3_ref[...], 0.0)         # (TI*TJ, 64) f32

    # Layer 4: 64 -> 1 as VPU multiply + lane reduce; lands as a lane-dense (TI, TJ) tile.
    h3 = h3.reshape(ti, tj, h3.shape[-1])
    out = jnp.sum(h3 * w4_ref[...], axis=-1) + b4_ref[...]        # (TI, TJ)
    o_ref[0] = out.astype(o_ref.dtype)


def _fold_bn(b, gamma, beta, mean, var):
    """Fold conv bias + eval-mode BatchNorm into per-channel scale/shift."""
    s = gamma / jnp.sqrt(var + EPS)
    t = s * (b - mean) + beta
    return s, t


def _round_up(x, m):
    return (x + m - 1) // m * m


@jax.jit
def scorenet_forward(x, params):
    B, C, N = x.shape
    xt = jnp.transpose(x, (0, 2, 1)).astype(jnp.float32)          # (B, N, C)

    # Fold conv bias + eval-mode BN into per-channel scale/shift.
    s1, t1 = _fold_bn(params["b1"], params["g1"], params["be1"], params["m1"], params["v1"])
    s2, t2 = _fold_bn(params["b2"], params["g2"], params["be2"], params["m2"], params["v2"])
    s3, t3 = _fold_bn(params["b3"], params["g3"], params["be3"], params["m3"], params["v3"])

    # Split layer 1 into per-point projections (tiny B*N*256 arrays).
    w1 = params["w1"].astype(jnp.float32)                          # (256, 2C)
    u = (xt @ w1[:, :C].T) * s1                                    # (B, N, 256) — varies with i
    v = (xt @ w1[:, C:].T) * s1 + t1                               # (B, N, 256) — varies with j
    H1 = u.shape[-1]

    # Remaining weights: bf16 operands for the MXU, f32 scale/shift for the VPU.
    w2 = params["w2"].T.astype(jnp.bfloat16)                       # (256, 128)
    w3 = params["w3"].T.astype(jnp.bfloat16)                       # (128, 64)
    w4 = params["w4"].reshape(1, -1).astype(jnp.float32)           # (1, 64)
    b4 = params["b4"].reshape(1, 1).astype(jnp.float32)            # (1, 1)

    # Tile selection: lane-dense output (TJ = padded N for small N, else 128),
    # ~2K pair-rows per grid step (VMEM ~<10 MiB, fine on v5e/v6e/v7x).
    if N <= 256:
        tj = _round_up(N, 8)
        npj = tj
    else:
        tj = 128
        npj = _round_up(N, tj)
    ti = max(8, min(_round_up(N, 8), _round_up(max(1, 2048 // tj), 8)))
    npi = _round_up(N, ti)

    if npi > N:
        u = jnp.pad(u, ((0, 0), (0, npi - N), (0, 0)))
    if npj > N:
        v = jnp.pad(v, ((0, 0), (0, npj - N), (0, 0)))

    def row(a):
        return a.reshape(1, -1).astype(jnp.float32)

    full = lambda shape: pl.BlockSpec(shape, lambda b, i, j: (0, 0))

    out = pl.pallas_call(
        scorenet_kernel,
        out_shape=jax.ShapeDtypeStruct((B, npi, npj), jnp.float32),
        grid_spec=pltpu.PrefetchScalarGridSpec(
            num_scalar_prefetch=0,
            grid=(B, npi // ti, npj // tj),
            in_specs=[
                pl.BlockSpec((1, ti, H1), lambda b, i, j: (b, i, 0)),   # U tile (i rows)
                pl.BlockSpec((1, tj, H1), lambda b, i, j: (b, j, 0)),   # V tile (j rows)
                full((H1, 128)), full((1, 128)), full((1, 128)),
                full((128, 64)), full((1, 64)), full((1, 64)),
                full((1, 64)), full((1, 1)),
            ],
            out_specs=pl.BlockSpec((1, ti, tj), lambda b, i, j: (b, i, j)),
        ),
        compiler_params=pltpu.CompilerParams(
            dimension_semantics=("parallel", "parallel", "parallel")),
    )(u, v,
      w2, row(s2), row(t2),
      w3, row(s3), row(t3),
      w4, b4)

    return out[:, :N, :N]


def ref_forward(x, params):
    """Pure-JAX reference mirroring the PyTorch forward (eval-mode BN), f32 throughout."""
    B, C, N = x.shape
    xt = jnp.transpose(x, (0, 2, 1))
    feat = jnp.concatenate(
        [jnp.broadcast_to(xt[:, :, None, :], (B, N, N, C)),
         jnp.broadcast_to(xt[:, None, :, :], (B, N, N, C))], axis=-1)
    h = feat.reshape(-1, 2 * C).astype(jnp.float32)
    for i in ("1", "2", "3"):
        h = h @ params["w" + i].T + params["b" + i]
        h = (h - params["m" + i]) * params["g" + i] / jnp.sqrt(params["v" + i] + EPS) \
            + params["be" + i]
        h = jnp.maximum(h, 0.0)
    h = h @ params["w4"].T + params["b4"]
    return h.reshape(B, N, N)


def init_params(key, in_ch):
    ks = jax.random.split(key, 32)
    p = {}
    dims = [(in_ch, 256), (256, 128), (128, 64), (64, 1)]
    k_idx = 0
    for li, (cin, cout) in enumerate(dims, start=1):
        p[f"w{li}"] = 0.1 * jax.random.normal(ks[k_idx], (cout, cin), jnp.float32); k_idx += 1
        p[f"b{li}"] = 0.1 * jax.random.normal(ks[k_idx], (cout,), jnp.float32); k_idx += 1
        if li < 4:  # BatchNorm params (eval-mode running stats)
            p[f"g{li}"] = 1.0 + 0.1 * jax.random.normal(ks[k_idx], (cout,), jnp.float32); k_idx += 1
            p[f"be{li}"] = 0.1 * jax.random.normal(ks[k_idx], (cout,), jnp.float32); k_idx += 1
            p[f"m{li}"] = 0.1 * jax.random.normal(ks[k_idx], (cout,), jnp.float32); k_idx += 1
            p[f"v{li}"] = jax.random.uniform(ks[k_idx], (cout,), jnp.float32, minval=0.5, maxval=1.5); k_idx += 1
    return p


if __name__ == "__main__":
    key = jax.random.PRNGKey(0)
    kx, kp = jax.random.split(key)

    B, C, N = 2, 4, 16          # x: (B, C, N) points; ScoreNet(in_ch=2*C)
    x = jax.random.normal(kx, (B, C, N), jnp.float32)
    params = init_params(kp, in_ch=2 * C)

    out = scorenet_forward(x, params)
    out = jax.block_until_ready(out)

    ref = ref_forward(x, params)
    assert out.shape == (B, N, N), out.shape
    err = float(jnp.max(jnp.abs(out - ref)))
    # bf16 MXU operands -> looser tolerance than the pure-f32 reference.
    assert jnp.allclose(out, ref, rtol=5e-2, atol=5e-2), err

    print("KERNEL_OK")
</pallas_src>

<mosaic_0001>
module attributes {stable_mosaic.version = 11 : i64} {
  func.func @scorenet_kernel(%arg0: i32, %arg1: i32, %arg2: i32, %arg3: memref<1x16x256xf32, #tpu.memory_space<vmem>>, %arg4: memref<1x16x256xf32, #tpu.memory_space<vmem>>, %arg5: memref<256x128xbf16, #tpu.memory_space<vmem>>, %arg6: memref<1x128xf32, #tpu.memory_space<vmem>>, %arg7: memref<1x128xf32, #tpu.memory_space<vmem>>, %arg8: memref<128x64xbf16, #tpu.memory_space<vmem>>, %arg9: memref<1x64xf32, #tpu.memory_space<vmem>>, %arg10: memref<1x64xf32, #tpu.memory_space<vmem>>, %arg11: memref<1x64xf32, #tpu.memory_space<vmem>>, %arg12: memref<1x1xf32, #tpu.memory_space<vmem>>, %arg13: memref<1x16x16xf32, #tpu.memory_space<vmem>>) attributes {dimension_semantics = [#tpu.dimension_semantics<parallel>, #tpu.dimension_semantics<parallel>, #tpu.dimension_semantics<parallel>], iteration_bounds = array<i64: 2, 1, 1>, scalar_prefetch = 0 : i64, scratch_operands = 0 : i64, tpu.core_type = #tpu.core_type<tc>, window_params = [{transform_indices = @transform_0, window_bounds = array<i64: 1, 16, 256>}, {transform_indices = @transform_1, window_bounds = array<i64: 1, 16, 256>}, {pipeline_mode = #tpu.pipeline_mode<synchronous>, transform_indices = @transform_2, window_bounds = array<i64: 256, 128>}, {pipeline_mode = #tpu.pipeline_mode<synchronous>, transform_indices = @transform_3, window_bounds = array<i64: 1, 128>}, {pipeline_mode = #tpu.pipeline_mode<synchronous>, transform_indices = @transform_4, window_bounds = array<i64: 1, 128>}, {pipeline_mode = #tpu.pipeline_mode<synchronous>, transform_indices = @transform_5, window_bounds = array<i64: 128, 64>}, {pipeline_mode = #tpu.pipeline_mode<synchronous>, transform_indices = @transform_6, window_bounds = array<i64: 1, 64>}, {pipeline_mode = #tpu.pipeline_mode<synchronous>, transform_indices = @transform_7, window_bounds = array<i64: 1, 64>}, {pipeline_mode = #tpu.pipeline_mode<synchronous>, transform_indices = @transform_8, window_bounds = array<i64: 1, 64>}, {pipeline_mode = #tpu.pipeline_mode<synchronous>, transform_indices = @transform_9, window_bounds = array<i64: 1, 1>}, {transform_indices = @transform_10, window_bounds = array<i64: 1, 16, 16>}]} {
    %c0 = arith.constant 0 : index
    %c0_0 = arith.constant 0 : index
    %c0_1 = arith.constant 0 : index
    %0 = vector.load %arg3[%c0, %c0_0, %c0_1] : memref<1x16x256xf32, #tpu.memory_space<vmem>>, vector<1x16x256xf32>
    %1 = vector.shape_cast %0 : vector<1x16x256xf32> to vector<16x256xf32>
    %c0_2 = arith.constant 0 : index
    %c0_3 = arith.constant 0 : index
    %c0_4 = arith.constant 0 : index
    %2 = vector.load %arg4[%c0_2, %c0_3, %c0_4] : memref<1x16x256xf32, #tpu.memory_space<vmem>>, vector<1x16x256xf32>
    %3 = vector.shape_cast %2 : vector<1x16x256xf32> to vector<16x256xf32>
    %4 = vector.shape_cast %1 : vector<16x256xf32> to vector<16x1x256xf32>
    %5 = vector.shape_cast %3 : vector<16x256xf32> to vector<1x16x256xf32>
    %6 = vector.broadcast %4 : vector<16x1x256xf32> to vector<16x16x256xf32>
    %7 = vector.broadcast %5 : vector<1x16x256xf32> to vector<16x16x256xf32>
    %8 = arith.addf %6, %7 : vector<16x16x256xf32>
    %cst = arith.constant 0.000000e+00 : f32
    %9 = vector.broadcast %cst : f32 to vector<16x16x256xf32>
    %10 = arith.maximumf %8, %9 : vector<16x16x256xf32>
    %11 = vector.shape_cast %10 : vector<16x16x256xf32> to vector<256x256xf32>
    %12 = arith.truncf %11 : vector<256x256xf32> to vector<256x256xbf16>
    %c0_5 = arith.constant 0 : index
    %c0_6 = arith.constant 0 : index
    %13 = vector.load %arg5[%c0_5, %c0_6] : memref<256x128xbf16, #tpu.memory_space<vmem>>, vector<256x128xbf16>
    %cst_7 = arith.constant dense<0.000000e+00> : vector<256x128xf32>
    %14 = tpu.matmul %12, %13, %cst_7 {dimension_numbers = #tpu.dot_dimension_numbers<[1], [0], [0], [1], [0, 0, 1, 1], [], []>} : vector<256x256xbf16>, vector<256x128xbf16>, vector<256x128xf32> -> vector<256x128xf32>
    %c0_8 = arith.constant 0 : index
    %c0_9 = arith.constant 0 : index
    %15 = vector.load %arg6[%c0_8, %c0_9] : memref<1x128xf32, #tpu.memory_space<vmem>>, vector<1x128xf32>
    %16 = vector.broadcast %15 : vector<1x128xf32> to vector<256x128xf32>
    %17 = arith.mulf %14, %16 : vector<256x128xf32>
    %c0_10 = arith.constant 0 : index
    %c0_11 = arith.constant 0 : index
    %18 = vector.load %arg7[%c0_10, %c0_11] : memref<1x128xf32, #tpu.memory_space<vmem>>, vector<1x128xf32>
    %19 = vector.broadcast %18 : vector<1x128xf32> to vector<256x128xf32>
    %20 = arith.addf %17, %19 : vector<256x128xf32>
    %cst_12 = arith.constant 0.000000e+00 : f32
    %21 = vector.broadcast %cst_12 : f32 to vector<256x128xf32>
    %22 = arith.maximumf %20, %21 : vector<256x128xf32>
    %23 = arith.truncf %22 : vector<256x128xf32> to vector<256x128xbf16>
    %c0_13 = arith.constant 0 : index
    %c0_14 = arith.constant 0 : index
    %24 = vector.load %arg8[%c0_13, %c0_14] : memref<128x64xbf16, #tpu.memory_space<vmem>>, vector<128x64xbf16>
    %cst_15 = arith.constant dense<0.000000e+00> : vector<256x64xf32>
    %25 = tpu.matmul %23, %24, %cst_15 {dimension_numbers = #tpu.dot_dimension_numbers<[1], [0], [0], [1], [0, 0, 1, 1], [], []>} : vector<256x128xbf16>, vector<128x64xbf16>, vector<256x64xf32> -> vector<256x64xf32>
    %c0_16 = arith.constant 0 : index
    %c0_17 = arith.constant 0 : index
    %26 = vector.load %arg9[%c0_16, %c0_17] : memref<1x64xf32, #tpu.memory_space<vmem>>, vector<1x64xf32>
    %27 = vector.broadcast %26 : vector<1x64xf32> to vector<256x64xf32>
    %28 = arith.mulf %25, %27 : vector<256x64xf32>
    %c0_18 = arith.constant 0 : index
    %c0_19 = arith.constant 0 : index
    %29 = vector.load %arg10[%c0_18, %c0_19] : memref<1x64xf32, #tpu.memory_space<vmem>>, vector<1x64xf32>
    %30 = vector.broadcast %29 : vector<1x64xf32> to vector<256x64xf32>
    %31 = arith.addf %28, %30 : vector<256x64xf32>
    %cst_20 = arith.constant 0.000000e+00 : f32
    %32 = vector.broadcast %cst_20 : f32 to vector<256x64xf32>
    %33 = arith.maximumf %31, %32 : vector<256x64xf32>
    %34 = vector.shape_cast %33 : vector<256x64xf32> to vector<16x16x64xf32>
    %c0_21 = arith.constant 0 : index
    %c0_22 = arith.constant 0 : index
    %35 = vector.load %arg11[%c0_21, %c0_22] : memref<1x64xf32, #tpu.memory_space<vmem>>, vector<1x64xf32>
    %36 = vector.shape_cast %35 : vector<1x64xf32> to vector<1x1x64xf32>
    %37 = vector.broadcast %36 : vector<1x1x64xf32> to vector<16x16x64xf32>
    %38 = arith.mulf %34, %37 : vector<16x16x64xf32>
    %cst_23 = arith.constant dense<0.000000e+00> : vector<16x16xf32>
    %39 = vector.multi_reduction <add>, %38, %cst_23 [2] : vector<16x16x64xf32> to vector<16x16xf32>
    %c0_24 = arith.constant 0 : index
    %c0_25 = arith.constant 0 : index
    %40 = vector.load %arg12[%c0_24, %c0_25] : memref<1x1xf32, #tpu.memory_space<vmem>>, vector<1x1xf32>
    %41 = vector.broadcast %40 : vector<1x1xf32> to vector<16x16xf32>
    %42 = arith.addf %39, %41 : vector<16x16xf32>
    %c0_26 = arith.constant 0 : index
    %c0_27 = arith.constant 0 : index
    %c0_28 = arith.constant 0 : index
    %43 = vector.load %arg13[%c0_26, %c0_27, %c0_28] : memref<1x16x16xf32, #tpu.memory_space<vmem>>, vector<1x16x16xf32>
    %44 = vector.shape_cast %43 : vector<1x16x16xf32> to vector<16x16xf32>
    %45 = vector.shape_cast %42 : vector<16x16xf32> to vector<1x16x16xf32>
    tpu.vector_store %arg13[%c0_26, %c0_27, %c0_28], %45 {strides = array<i32>} : memref<1x16x16xf32, #tpu.memory_space<vmem>>, vector<1x16x16xf32>,
    return
  }
  func.func @transform_0(%arg0: i32, %arg1: i32, %arg2: i32) -> (i32, i32, i32) {
    %c0_i32 = arith.constant 0 : i32
    %c0_i32_0 = arith.constant 0 : i32
    return %arg0, %arg1, %c0_i32 : i32, i32, i32
  }
  func.func @transform_1(%arg0: i32, %arg1: i32, %arg2: i32) -> (i32, i32, i32) {
    %c0_i32 = arith.constant 0 : i32
    %c0_i32_0 = arith.constant 0 : i32
    return %arg0, %arg2, %c0_i32 : i32, i32, i32
  }
  func.func @transform_2(%arg0: i32, %arg1: i32, %arg2: i32) -> (i32, i32) {
    %c0_i32 = arith.constant 0 : i32
    %c0_i32_0 = arith.constant 0 : i32
    %c0_i32_1 = arith.constant 0 : i32
    return %c0_i32, %c0_i32_0 : i32, i32
  }
  func.func @transform_3(%arg0: i32, %arg1: i32, %arg2: i32) -> (i32, i32) {
    %c0_i32 = arith.constant 0 : i32
    %c0_i32_0 = arith.constant 0 : i32
    %c0_i32_1 = arith.constant 0 : i32
    return %c0_i32, %c0_i32_0 : i32, i32
  }
  func.func @transform_4(%arg0: i32, %arg1: i32, %arg2: i32) -> (i32, i32) {
    %c0_i32 = arith.constant 0 : i32
    %c0_i32_0 = arith.constant 0 : i32
    %c0_i32_1 = arith.constant 0 : i32
    return %c0_i32, %c0_i32_0 : i32, i32
  }
  func.func @transform_5(%arg0: i32, %arg1: i32, %arg2: i32) -> (i32, i32) {
    %c0_i32 = arith.constant 0 : i32
    %c0_i32_0 = arith.constant 0 : i32
    %c0_i32_1 = arith.constant 0 : i32
    return %c0_i32, %c0_i32_0 : i32, i32
  }
  func.func @transform_6(%arg0: i32, %arg1: i32, %arg2: i32) -> (i32, i32) {
    %c0_i32 = arith.constant 0 : i32
    %c0_i32_0 = arith.constant 0 : i32
    %c0_i32_1 = arith.constant 0 : i32
    return %c0_i32, %c0_i32_0 : i32, i32
  }
  func.func @transform_7(%arg0: i32, %arg1: i32, %arg2: i32) -> (i32, i32) {
    %c0_i32 = arith.constant 0 : i32
    %c0_i32_0 = arith.constant 0 : i32
    %c0_i32_1 = arith.constant 0 : i32
    return %c0_i32, %c0_i32_0 : i32, i32
  }
  func.func @transform_8(%arg0: i32, %arg1: i32, %arg2: i32) -> (i32, i32) {
    %c0_i32 = arith.constant 0 : i32
    %c0_i32_0 = arith.constant 0 : i32
    %c0_i32_1 = arith.constant 0 : i32
    return %c0_i32, %c0_i32_0 : i32, i32
  }
  func.func @transform_9(%arg0: i32, %arg1: i32, %arg2: i32) -> (i32, i32) {
    %c0_i32 = arith.constant 0 : i32
    %c0_i32_0 = arith.constant 0 : i32
    %c0_i32_1 = arith.constant 0 : i32
    return %c0_i32, %c0_i32_0 : i32, i32
  }
  func.func @transform_10(%arg0: i32, %arg1: i32, %arg2: i32) -> (i32, i32, i32) {
    %c0_i32 = arith.constant 0 : i32
    return %arg0, %arg1, %arg2 : i32, i32, i32
  }
}

</mosaic_0001>

<bundles_post_ra>
// kernel: scorenet_forward.1
= control target key start
LH: loop header
LB: loop body
LE: loop exit
PB: predicated region body
PF: predicated region fallthrough
CT: control target
= control target key end

     0   :  { %s2903_s0 = inlined_call_operand.vmem [shape: f32[2,16,256], index: 0, kind: input, shape index: {}]   ;;  %s2904_s1 = inlined_call_operand.vmem [shape: f32[2,16,256], index: 1, kind: input, shape index: {}]   ;;  %s2905_s2 = inlined_call_operand.vmem [shape: bf16[256,128], index: 2, kind: input, shape index: {}]   ;;  %s2906_s3 = inlined_call_operand.vmem [shape: f32[1,128], index: 3, kind: input, shape index: {}]   ;;  %s2907_s4 = inlined_call_operand.vmem [shape: f32[1,128], index: 4, kind: input, shape index: {}]   ;;  %s2908_s5 = inlined_call_operand.vmem [shape: bf16[128,64], index: 5, kind: input, shape index: {}]   ;;  %s2909_s6 = inlined_call_operand.vmem [shape: f32[1,64], index: 6, kind: input, shape index: {}]   ;;  %s2910_s7 = inlined_call_operand.vmem [shape: f32[1,64], index: 7, kind: input, shape index: {}]   ;;  %s2911_s8 = inlined_call_operand.vmem [shape: f32[1,64], index: 8, kind: input, shape index: {}]   ;;  %s2912_s9 = inlined_call_operand.<no memory space> [shape: f32[1,1], index: 9, kind: input, shape index: {}]   ;;  %s2913_s10 = inlined_call_operand.hbm [shape: f32[2,16,16], index: 10, kind: output, shape index: {}]  }
   0x1   :  { %v15_v0 = vstv %s2912_s9 }
   0x2   :  { %16 = vst [vmem:[#allocation2] sm:$0x1] %v15_v0 }
   0x3   :  { %17 = vsyncpa [#allocation4], 0 }
   0x4   :  { %19 = vsyncpa [#allocation4 + $0x1], 0  ;;  %s2172_s15 = smov 0   ;;  %s2174_s16 = smov 0  }
   0x5   :  { %s2176_s17 = smov 0   ;;  %s2178_s18 = smov 0  }
   0x6   :  { %s2180_s19 = smov 0   ;;  %s2182_s20 = smov 0  }
   0x7 LB: > { %s1803_s9 = sadd.s32 4294967295, %s2109_s20   ;;  %s1804_s21 = sadd.s32 4294967294, %s2109_s20   ;;  %s2109_s20 = sphi %s2182_s20, %s25_s20   ;;  %s2105_s19 = sphi %s2180_s19, %s2920_s19   ;;  %s2101_s18 = sphi %s2178_s18, %s2919_s18   ;;  %s2097_s17 = sphi %s2176_s17, %s2918_s17   ;;  %s2093_s16 = sphi %s2174_s16, %s2917_s16   ;;  %s2089_s15 = sphi %s2172_s15, %s2916_s15  }
   0x8   : > { %s44_s22 = sadd.s32 1, %s2105_s19  ;;  %s279_s23 = sadd.s32 1, %s2097_s17 }
   0x9   : > { %p46_p0 = scmp.ge.s32.totalorder %s44_s22, 2  ;;  %p289_p1 = scmp.ne.s32.totalorder %s2097_s17, %s2093_s16 }
   0xa   : > { %p290_p2 = scmp.eq.s32.totalorder %s1803_s9, 1  ;;  %p295_p3 = scmp.ne.s32.totalorder %s2093_s16, %s2089_s15 }
   0xb   : > { %s2922_s22 = smov (%p46_p0, %s44_s22), 0  ;;  %p296_p5 = scmp.eq.s32.totalorder %s1804_s21, 1 }
   0xc   : > { %p2212_p4 = por %p290_p2, %p289_p1  ;;  %s272_s25 = ssub.s32 %s2105_s19, %s2922_s22 }
   0xd   : > { %p1807_p6 = scmp.ge.s32.totalorder %s2109_s20, 1  ;;  %p277_p7 = scmp.eq.s32.totalorder %s272_s25, 0 }
   0xe   : > { %p2219_p8 = por %p296_p5, %p295_p3  ;;  %p366_p9 = scmp.lt.s32.totalorder %s2109_s20, 3 }
   0xf   : > { %s2225_s27 = scalar_select %p277_p7, %s2097_s17, %s279_s23  }
  0x10   : > { %p367_p10 = pnand %p1807_p6, %p366_p9 }
  0x11   : > { %p420_p11 = scmp.lt.s32.totalorder (!%p367_p10), %s2101_s18, 1  ;;  %s416_s30 = sand.u32 (!%p367_p10), 1, %s2093_s16  }
  0x12   : > { %370 = sbr.rel (%p367_p10) target bundleno = 659 (0x293), region = 60  ;;  %s1808_s11 = sshll.u32 (!%p367_p10), %s416_s30, 4 }
  0x13   : > { %s2818_s12 = scalar_lea.vmem (!%p367_p10), [#allocation3], %s1808_s11  ;;  %s1678_s25 = scalar_lea.sflag (!%p367_p10), [#allocation4], %s416_s30 }
  0x14   : > { %s2051_s13 = scalar_lea.hbm (!%p367_p10), %s2913_s10, 32 }
  0x17   : > { %v1923_v1 = vld [vmem:[%s2905_s2 + $0x38] sm:$0xff]  ;;  %v1922_v3 = vld [vmem:[%s2905_s2 + $0x30] sm:$0xff]  ;;  %s2240_s14 = scalar_select %p420_p11, %s2101_s18, 1  ;;  %v1921_v5 = vld [vmem:[%s2905_s2 + $0x28] sm:$0xff]  ;;  %vm467_vm0 = vcmask 1044484   ;;  %vm456_vm1 = vcmask 1040384  }
  0x18   : > { %v2233_v2 = vld [vmem:[%s2905_s2 + $0x78] sm:$0xff]  ;;  %846 = vmatpush.bf16.msra.mxu0 %v1923_v1  ;;  %1941 = vmatpush.bf16.msra.mxu3 %v1923_v1  ;;  %v2246_v4 = vld [vmem:[%s2905_s2 + $0x70] sm:$0xff]  ;;  %v2259_v7 = vld [vmem:[%s2905_s2 + $0x68] sm:$0xff]  ;;  %vm458_vm2 = vcmask 1041409   ;;  %vm470_vm3 = vcmask 1045509   ;;  %vm461_vm4 = vcmask 1042434  }
  0x19   : > { %935 = vmatpush.bf16.msra.mxu1 %v2233_v2  ;;  %s1914_s23 = sshll.u32 %s2240_s14, 5  ;;  %v1920_v11 = vld [vmem:[%s2905_s2 + $0x20] sm:$0xff]  ;;  %v1919_v17 = vld [vmem:[%s2905_s2 + $0x18] sm:$0xff]  ;;  %v1918_v22 = vld [vmem:[%s2905_s2 + $0x10] sm:$0xff]  ;;  %vm473_vm5 = vcmask 1046534   ;;  %vm464_vm6 = vcmask 1043459  }
  0x1a   : > { %s428_s29 = scalar_lea.vmem %s2903_s0, %s1914_s23  ;;  %v2279_v14 = vld [vmem:[%s2905_s2 + $0x60] sm:$0xff]  ;;  %v2294_v19 = vld [vmem:[%s2905_s2 + $0x58] sm:$0xff]  ;;  %s439_s14 = scalar_lea.vmem %s2904_s1, %s1914_s23  ;;  %v2312_v26 = vld [vmem:[%s2905_s2 + $0x50] sm:$0xff]  ;;  %vm476_vm7 = vcmask 1046528   ;;  %vm1437_vm8 = vcmask 523264   ;;  %vm1610_vm9 = vcmask 130112  }
  0x1b   : > { %v445_v6 = vld [vmem:[%s428_s29 + $0x18] sm:$0xff]  ;;  %v443_v8 = vld [vmem:[%s428_s29 + $0x8] sm:$0xff]  ;;  %v2263_v10 = vld [vmem:[%s428_s29 + $0x10] sm:$0xff]  ;;  %vm1663_vm10 = vcmask 1047559   ;;  %vm1674_vm11 = vcmask 130048  }
  0x1c   : > { %847 = vmatpush.bf16.msra.mxu0 %v1922_v3  ;;  %1942 = vmatpush.bf16.msra.mxu3 %v1922_v3  ;;  %v2261_v9 = vrot.slane %v445_v6, 7  ;;  %v2268_v12 = vrot.slane %v443_v8, 7  ;;  %v2281_v15 = vld [vmem:[%s428_s29] sm:$0xff]  ;;  %v2306_v24 = vld [vmem:[%s439_s14 + $0x10] sm:$0xff]  ;;  %v2314_v27 = vld [vmem:[%s439_s14 + $0x8] sm:$0xff]  ;;  %s1940_s29 = sshll.u32 %s2101_s18, 4 }
  0x1d   : > { %936 = vmatpush.bf16.msra.mxu1 %v2246_v4  ;;  %v2304_v23 = vld [vmem:[%s439_s14] sm:$0xff]  ;;  %v2316_v28 = vld [vmem:[%s439_s14 + $0x18] sm:$0xff]  ;;  %v1917_v33 = vld [vmem:[%s2905_s2 + $0x8] sm:$0xff]  ;;  %s1692_s9 = scalar_lea.hbm %s2913_s10, %s1940_s29  ;;  %s1693_s18 = sshll.u32 %s2818_s12, 4  ;;  %s1694_s18 = int_to_ptr.vmem [resolvable:$true] %s1693_s18 }
  0x1e   : > { %v2273_v13 = vsel %vm467_vm0, %v2263_v10, %v2261_v9  ;;  %v457_v18 = vsel %vm456_vm1, %v2281_v15, %v2268_v12  ;;  %v2331_v36 = vld [vmem:[%s2905_s2 + $0x48] sm:$0xff]  ;;  %v1916_v41 = vld [vmem:[%s2905_s2] sm:$0xff]  ;;  %v459_v44 = vsel %vm458_vm2, %v2281_v15, %v2268_v12  ;;  %v2342_v45 = vsel %vm470_vm3, %v2263_v10, %v2261_v9  ;;  %s1695_s21 = sshll.u32 %s1692_s9, 4  ;;  %s1696_s21 = int_to_ptr.hbm [resolvable:$true] %s1695_s21 }
  0x1f   : > { %v487_v16 = vrot.slane %v2273_v13, 4  ;;  %v494_v20 = vperm.slane %v457_v18, 0  ;;  %v495_v25 = vperm.slane %v457_v18, 1  ;;  %v2348_v46 = vld [vmem:[%s2905_s2 + $0x40] sm:$0xff]  ;;  %v460_v49 = vrot.slane %v459_v44, 1  ;;  %s2045_s28 = sshra.s32 %s1696_s21, 4  ;;  %s2046_s28 = int_to_ptr.hbm [resolvable:$true] %s2045_s28 }
  0x20   : > { %848 = vmatpush.bf16.msra.mxu0 %v1921_v5  ;;  %1943 = vmatpush.bf16.msra.mxu3 %v1921_v5  ;;  %v489_v50 = vrot.slane %v2342_v45, 5  ;;  %v462_v3 = vsel %vm461_vm4, %v2281_v15, %v2268_v12  ;;  %s2047_s23 = scalar_lea.hbm %s2046_s28, 16  ;;  %p2052_p1 = scmp.lt.s32.totalorder %s2046_s28, %s2913_s10 }
  0x21   : > { %937 = vmatpush.bf16.msra.mxu1 %v2259_v7  ;;  %v518_v21 = vperm.slane %v487_v16, 0  ;;  %v558_v29 = vadd.f32 %v494_v20, %v2304_v23  ;;  %v560_v30 = vadd.f32 %v494_v20, %v2306_v24  ;;  %v559_v34 = vadd.f32 %v495_v25, %v2314_v27  ;;  %p2048_p12 = scmp.ne.s32.totalorder %s2046_s28, %s2047_s23  ;;  %p2053_p2 = scmp.lt.s32.totalorder %s2051_s13, %s2047_s23 }
  0x22   : > { %v561_v35 = vadd.f32 %v495_v25, %v2316_v28  ;;  %v496_v52 = vperm.slane %v460_v49, 0  ;;  %v520_v53 = vperm.slane %v489_v50, 0  ;;  %v497_v54 = vperm.slane %v460_v49, 1 }
  0x23   : > { %v606_v31 = vadd.f32 %v518_v21, %v2304_v23  ;;  %v608_v32 = vadd.f32 %v518_v21, %v2306_v24  ;;  %v622_v37 = vmax.f32 %v558_v29, 0.0  ;;  %v624_v38 = vmax.f32 %v560_v30, 0.0  ;;  %p2049_p13 = pnand %p2048_p12, %p2212_p4  ;;  %p2054_p3 = por %p2053_p2, %p2052_p1 }
  0x24   : > { %849 = vmatpush.bf16.msra.mxu0 %v1920_v11  ;;  %1944 = vmatpush.bf16.msra.mxu3 %v1920_v11  ;;  %v623_v42 = vmax.f32 %v559_v34, 0.0  ;;  %v625_v43 = vmax.f32 %v561_v35, 0.0  ;;  %v562_v55 = vadd.f32 %v496_v52, %v2304_v23  ;;  %v564_v56 = vadd.f32 %v496_v52, %v2306_v24 }
  0x25   : > { %938 = vmatpush.bf16.msra.mxu1 %v2279_v14  ;;  %v670_v39 = vmax.f32 %v606_v31, 0.0  ;;  %v672_v40 = vmax.f32 %v608_v32, 0.0  ;;  %v686_v47 = vpack.c.bf16 %v624_v38, %v622_v37  ;;  %v610_v57 = vadd.f32 %v520_v53, %v2304_v23  ;;  %p2050_p0 = pneg %p2049_p13 }
  0x26   : > { %v687_v51 = vpack.c.bf16 %v625_v43, %v623_v42  ;;  %v612_v58 = vadd.f32 %v520_v53, %v2306_v24  ;;  %v563_v59 = vadd.f32 %v497_v54, %v2314_v27  ;;  %v565_v60 = vadd.f32 %v497_v54, %v2316_v28 }
  0x27   : > { %v710_v48 = vpack.c.bf16 %v672_v40, %v670_v39  ;;  %v626_v61 = vmax.f32 %v562_v55, 0.0  ;;  %v628_v62 = vmax.f32 %v564_v56, 0.0  ;;  %v674_v63 = vmax.f32 %v610_v57, 0.0  ;;  %p2055_p5 = pnand %p2054_p3, %p2050_p0 }
  0x28   : > { %850 = vmatpush.bf16.msra.mxu0 %v1919_v17  ;;  %1945 = vmatpush.bf16.msra.mxu3 %v1919_v17  ;;  %v676_v0 = vmax.f32 %v612_v58, 0.0  ;;  %v627_v1 = vmax.f32 %v563_v59, 0.0  ;;  %v465_v35 = vsel %vm464_vm6, %v2281_v15, %v2268_v12  ;;  %v2390_v37 = vsel %vm476_vm7, %v2261_v9, %v2263_v10 }
  0x29   : > { %939 = vmatpush.bf16.msra.mxu1 %v2294_v19  ;;  %v688_v5 = vpack.c.bf16 %v628_v62, %v626_v61  ;;  %v493_v40 = vrot.slane %v2390_v37, 7  ;;  %v468_v59 = vsel %vm467_vm0, %v2281_v15, %v2268_v12  ;;  %v1934_v37 = vld [vmem:[%s2908_s5 + $0x10] sm:$0xff] }
  0x2a   : > { %v712_v6 = vpack.c.bf16 %v676_v0, %v674_v63  ;;  %v469_v62 = vrot.slane %v468_v59, 4 }
  0x2b   : > { %v524_v43 = vperm.slane %v493_v40, 0 }
  0x2c   : > { %851 = vmatpush.bf16.msra.mxu0 %v1918_v22  ;;  %1946 = vmatpush.bf16.msra.mxu3 %v1918_v22  ;;  %v502_v0 = vperm.slane %v469_v62, 0 }
  0x2d   : > { %940 = vmatpush.bf16.msra.mxu1 %v2312_v26  ;;  %v620_v49 = vadd.f32 %v524_v43, %v2306_v24 }
  0x2f   : > { %v684_v56 = vmax.f32 %v620_v49, 0.0 }
  0x30   : > { %852 = vmatpush.bf16.msra.mxu0 %v1917_v33  ;;  %1947 = vmatpush.bf16.msra.mxu3 %v1917_v33 }
  0x31   : > { %941 = vmatpush.bf16.msra.mxu1 %v2331_v36 }
  0x34   : > { %853 = vmatpush.bf16.msra.mxu0 %v1916_v41  ;;  %1948 = vmatpush.bf16.msra.mxu3 %v1916_v41 }
  0x35   : > { %942 = vmatpush.bf16.msra.mxu1 %v2348_v46 }
  0x37   : > { %854 = vmatmul.bf16.vlgmr.msra.gmra.mxu0 %v686_v47  ;;  %914 = vmatmul.bf16.vlgmr.msra.gmra.mxu3 %v710_v48 }
  0x38   : > { %1949 = vmatpush.bf16.msrb.mxu3 %v2233_v2  ;;  %943 = vmatmul.bf16.vlgmr.msra.gmra.mxu1 %v687_v51  ;;  %v629_v2 = vmax.f32 %v565_v60, 0.0 }
  0x3a   : > { %v689_v11 = vpack.c.bf16 %v629_v2, %v627_v1  ;;  %v519_v1 = vperm.slane %v487_v16, 1  ;;  %v503_v2 = vperm.slane %v469_v62, 1 }
  0x3c   : > { %1950 = vmatpush.bf16.msrb.mxu3 %v2246_v4  ;;  %v2369_v4 = vsel %vm473_vm5, %v2263_v10, %v2261_v9 }
  0x3d   : > { %v491_v8 = vrot.slane %v2369_v4, 6 }
  0x3f   : > { %v522_v18 = vperm.slane %v491_v8, 0 }
  0x40   : > { %1951 = vmatpush.bf16.msrb.mxu3 %v2259_v7  ;;  %v463_v7 = vrot.slane %v462_v3, 2  ;;  %v574_v3 = vadd.f32 %v502_v0, %v2304_v23 }
  0x41   : > { %v614_v22 = vadd.f32 %v522_v18, %v2304_v23  ;;  %v616_v25 = vadd.f32 %v522_v18, %v2306_v24 }
  0x42   : > { %v498_v17 = vperm.slane %v463_v7, 0  ;;  %v499_v20 = vperm.slane %v463_v7, 1  ;;  %v609_v7 = vadd.f32 %v519_v1, %v2316_v28  ;;  %v638_v18 = vmax.f32 %v574_v3, 0.0 }
  0x43   : > { %v678_v32 = vmax.f32 %v614_v22, 0.0  ;;  %v471_v22 = vsel %vm470_vm3, %v2281_v15, %v2268_v12 }
  0x44   : > { %1952 = vmatpush.bf16.msrb.mxu3 %v2279_v14  ;;  %v566_v14 = vadd.f32 %v498_v17, %v2304_v23  ;;  %v568_v21 = vadd.f32 %v498_v17, %v2306_v24  ;;  %v569_v29 = vadd.f32 %v499_v20, %v2316_v28  ;;  %v577_v17 = vadd.f32 %v503_v2, %v2316_v28 }
  0x46   : > { %v630_v30 = vmax.f32 %v566_v14, 0.0  ;;  %v632_v31 = vmax.f32 %v568_v21, 0.0  ;;  %v633_v34 = vmax.f32 %v569_v29, 0.0  ;;  %v673_v21 = vmax.f32 %v609_v7, 0.0 }
  0x47   : > { %859 = vmatmul.bf16.gmra.mxu0 %v688_v5  ;;  %919 = vmatmul.bf16.gmra.mxu3 %v712_v6  ;;  %v576_v5 = vadd.f32 %v502_v0, %v2306_v24  ;;  %v607_v6 = vadd.f32 %v519_v1, %v2314_v27  ;;  %v641_v16 = vmax.f32 %v577_v17, 0.0  ;;  %v472_v29 = vrot.slane %v471_v22, 5  ;;  %v1936_v17 = vld [vmem:[%s2908_s5 + $0x20] sm:$0xff] }
  0x48   : > { %1953 = vmatpush.bf16.msrb.mxu3 %v2294_v19  ;;  %948 = vmatmul.bf16.gmra.mxu1 %v689_v11  ;;  %v567_v19 = vadd.f32 %v499_v20, %v2314_v27  ;;  %v690_v38 = vpack.c.bf16 %v632_v31, %v630_v30  ;;  %v575_v11 = vadd.f32 %v503_v2, %v2314_v27 }
  0x49   : > { %v640_v20 = vmax.f32 %v576_v5, 0.0  ;;  %v671_v14 = vmax.f32 %v607_v6, 0.0  ;;  %v504_v31 = vperm.slane %v472_v29, 0  ;;  %v477_v5 = vsel %vm476_vm7, %v2268_v12, %v2281_v15 }
  0x4a   : > { %v631_v33 = vmax.f32 %v567_v19, 0.0  ;;  %v639_v13 = vmax.f32 %v575_v11, 0.0  ;;  %v478_v11 = vrot.slane %v477_v5, 7 }
  0x4b   : > { %v711_v19 = vpack.c.bf16 %v673_v21, %v671_v14  ;;  %v525_v14 = vperm.slane %v493_v40, 1 }
  0x4c   : > { %1954 = vmatpush.bf16.msrb.mxu3 %v2312_v26  ;;  %v680_v26 = vmax.f32 %v616_v25, 0.0  ;;  %v691_v41 = vpack.c.bf16 %v633_v34, %v631_v33  ;;  %v694_v25 = vpack.c.bf16 %v640_v20, %v638_v18  ;;  %v695_v30 = vpack.c.bf16 %v641_v16, %v639_v13 }
  0x4d   : > { %v578_v33 = vadd.f32 %v504_v31, %v2304_v23  ;;  %v580_v34 = vadd.f32 %v504_v31, %v2306_v24  ;;  %v508_v20 = vperm.slane %v478_v11, 0  ;;  %v619_v16 = vadd.f32 %v525_v14, %v2314_v27 }
  0x4e   : > { %v714_v39 = vpack.c.bf16 %v680_v26, %v678_v32  ;;  %v521_v32 = vperm.slane %v489_v50, 1  ;;  %v505_v26 = vperm.slane %v472_v29, 1  ;;  %v621_v22 = vadd.f32 %v525_v14, %v2316_v28 }
  0x4f   : > { %v586_v21 = vadd.f32 %v508_v20, %v2304_v23  ;;  %v588_v13 = vadd.f32 %v508_v20, %v2306_v24  ;;  %v482_v14 = vsel %vm461_vm4, %v2263_v10, %v2261_v9 }
  0x50   : > { %1955 = vmatpush.bf16.msrb.mxu3 %v2331_v36  ;;  %v466_v36 = vrot.slane %v465_v35, 3  ;;  %v611_v35 = vadd.f32 %v521_v32, %v2314_v27  ;;  %v685_v31 = vmax.f32 %v621_v22, 0.0 }
  0x51   : > { %v652_v29 = vmax.f32 %v588_v13, 0.0  ;;  %v483_v13 = vrot.slane %v482_v14, 2 }
  0x52   : > { %v500_v42 = vperm.slane %v466_v36, 0  ;;  %v501_v44 = vperm.slane %v466_v36, 1  ;;  %v581_v36 = vadd.f32 %v505_v26, %v2316_v28 }
  0x54   : > { %1956 = vmatpush.bf16.msrb.mxu3 %v2348_v46  ;;  %v570_v47 = vadd.f32 %v500_v42, %v2304_v23  ;;  %v572_v48 = vadd.f32 %v500_v42, %v2306_v24  ;;  %v618_v46 = vadd.f32 %v524_v43, %v2304_v23  ;;  %v571_v51 = vadd.f32 %v501_v44, %v2314_v27 }
  0x55   : > { %v573_v52 = vadd.f32 %v501_v44, %v2316_v28  ;;  %v644_v42 = vmax.f32 %v580_v34, 0.0  ;;  %v675_v43 = vmax.f32 %v611_v35, 0.0  ;;  %v645_v50 = vmax.f32 %v581_v36, 0.0 }
  0x56   : > { %v634_v53 = vmax.f32 %v570_v47, 0.0  ;;  %v636_v54 = vmax.f32 %v572_v48, 0.0  ;;  %v682_v55 = vmax.f32 %v618_v46, 0.0  ;;  %v635_v57 = vmax.f32 %v571_v51, 0.0 }
  0x57   : > { %864 = vmatmul.bf16.gmra.mxu0 %v690_v38  ;;  %924 = vmatmul.bf16.gmra.mxu3 %v714_v39  ;;  %v637_v58 = vmax.f32 %v573_v52, 0.0  ;;  %v613_v38 = vadd.f32 %v521_v32, %v2316_v28  ;;  %v579_v39 = vadd.f32 %v505_v26, %v2314_v27  ;;  %v474_v47 = vsel %vm473_vm5, %v2281_v15, %v2268_v12  ;;  %v1935_v12 = vld [vmem:[%s2908_s5 + $0x18] sm:$0xff]  ;;  %v1933_v32 = vld [vmem:[%s2908_s5 + $0x8] sm:$0xff] }
  0x58   : > { %953 = vmatmul.bf16.gmra.mxu1 %v691_v41  ;;  %v692_v60 = vpack.c.bf16 %v636_v54, %v634_v53  ;;  %v716_v61 = vpack.c.bf16 %v684_v56, %v682_v55  ;;  %v642_v41 = vmax.f32 %v578_v33, 0.0  ;;  %v475_v49 = vrot.slane %v474_v47, 6  ;;  %v1939_v54 = vld [vmem:[%s2908_s5 + $0x38] sm:$0xff]  ;;  %v1938_v56 = vld [vmem:[%s2908_s5 + $0x30] sm:$0xff] }
  0x59   : > { %v693_v63 = vpack.c.bf16 %v637_v58, %v635_v57  ;;  %v677_v44 = vmax.f32 %v613_v38, 0.0  ;;  %v643_v45 = vmax.f32 %v579_v39, 0.0  ;;  %v523_v53 = vperm.slane %v491_v8, 1  ;;  %1208 = vmatpush.bf16.msra.mxu2 %v1939_v54  ;;  %1957 = vmatpush.bf16.msra.mxu3 %v1939_v54  ;;  %v1932_v38 = vld [vmem:[%s2908_s5] sm:$0xff] }
  0x5a   : > { %v696_v48 = vpack.c.bf16 %v644_v42, %v642_v41  ;;  %v506_v52 = vperm.slane %v475_v49, 0  ;;  %v507_v55 = vperm.slane %v475_v49, 1  ;;  %v509_v15 = vperm.slane %v478_v11, 1 }
  0x5b   : > { %v713_v46 = vpack.c.bf16 %v677_v44, %v675_v43  ;;  %v697_v51 = vpack.c.bf16 %v645_v50, %v643_v45  ;;  %v615_v59 = vadd.f32 %v523_v53, %v2314_v27  ;;  %v617_v4 = vadd.f32 %v523_v53, %v2316_v28 }
  0x5c   : > { %v582_v57 = vadd.f32 %v506_v52, %v2304_v23  ;;  %v584_v58 = vadd.f32 %v506_v52, %v2306_v24  ;;  %v583_v8 = vadd.f32 %v507_v55, %v2314_v27  ;;  %v587_v40 = vadd.f32 %v509_v15, %v2314_v27 }
  0x5d   : > { %1209 = vmatpush.bf16.msra.mxu2 %v1938_v56  ;;  %1958 = vmatpush.bf16.msra.mxu3 %v1938_v56  ;;  %v679_v0 = vmax.f32 %v615_v59, 0.0  ;;  %v681_v1 = vmax.f32 %v617_v4, 0.0  ;;  %v479_v36 = vsel %vm456_vm1, %v2263_v10, %v2261_v9  ;;  %v2483_v4 = vld [vmem:[%s2906_s3] ss:$0 sm:$0xff] }
  0x5e   : > { %v646_v62 = vmax.f32 %v582_v57, 0.0  ;;  %v647_v2 = vmax.f32 %v583_v8, 0.0  ;;  %v651_v26 = vmax.f32 %v587_v40, 0.0  ;;  %v510_v41 = vperm.slane %v479_v36, 0 }
  0x5f   : > { %v715_v7 = vpack.c.bf16 %v681_v1, %v679_v0  ;;  %v511_v42 = vperm.slane %v479_v36, 1 }
  0x60   : > { %v590_v43 = vadd.f32 %v510_v41, %v2304_v23  ;;  %v592_v44 = vadd.f32 %v510_v41, %v2306_v24 }
  0x61   : > { %v591_v45 = vadd.f32 %v511_v42, %v2314_v27  ;;  %v593_v50 = vadd.f32 %v511_v42, %v2316_v28 }
  0x62   : > { %v654_v47 = vmax.f32 %v590_v43, 0.0 }
  0x63   : > { %v657_v49 = vmax.f32 %v593_v50, 0.0 }
  0x67   : > { %869 = vmatmul.bf16.gmra.mxu0 %v692_v60  ;;  %929 = vmatmul.bf16.gmra.mxu3 %v716_v61  ;;  %v585_v60 = vadd.f32 %v507_v55, %v2316_v28  ;;  %v1937_v61 = vld [vmem:[%s2908_s5 + $0x28] sm:$0xff] }
  0x68   : > { %958 = vmatmul.bf16.gmra.mxu1 %v693_v63  ;;  %v648_v63 = vmax.f32 %v584_v58, 0.0  ;;  %1210 = vmatpush.bf16.msra.mxu2 %v1937_v61 }
  0x69   : > { %v649_v3 = vmax.f32 %v585_v60, 0.0  ;;  %1959 = vmatpush.bf16.msra.mxu3 %v1937_v61 }
  0x6a   : > { %v698_v6 = vpack.c.bf16 %v648_v63, %v646_v62 }
  0x6b   : > { %v699_v18 = vpack.c.bf16 %v649_v3, %v647_v2  ;;  %v2495_v2 = vld [vmem:[%s2907_s4] ss:$0 sm:$0xff] }
  0x6c   : > { %1211 = vmatpush.bf16.msra.mxu2 %v1936_v17 }
  0x6d   : > { %1960 = vmatpush.bf16.msra.mxu3 %v1936_v17 }
  0x70   : > { %1212 = vmatpush.bf16.msra.mxu2 %v1935_v12 }
  0x71   : > { %1961 = vmatpush.bf16.msra.mxu3 %v1935_v12 }
  0x74   : > { %1213 = vmatpush.bf16.msra.mxu2 %v1934_v37 }
  0x75   : > { %1962 = vmatpush.bf16.msra.mxu3 %v1934_v37 }
  0x77   : > { %874 = vmatmul.bf16.gmra.mxu0 %v694_v25  ;;  %1003 = vmatmul.bf16.vlgmr.msrb.gmra.mxu3 %v711_v19  ;;  %v589_v25 = vadd.f32 %v509_v15, %v2316_v28  ;;  %v650_v19 = vmax.f32 %v586_v21, 0.0 }
  0x78   : > { %963 = vmatmul.bf16.gmra.mxu1 %v695_v30  ;;  %v683_v30 = vmax.f32 %v619_v16, 0.0  ;;  %1214 = vmatpush.bf16.msra.mxu2 %v1933_v32 }
  0x79   : > { %v653_v33 = vmax.f32 %v589_v25, 0.0  ;;  %1963 = vmatpush.bf16.msra.mxu3 %v1933_v32  ;;  %v700_v34 = vpack.c.bf16 %v652_v29, %v650_v19  ;;  %v514_v29 = vperm.slane %v483_v13, 0 }
  0x7a   : > { %v717_v35 = vpack.c.bf16 %v685_v31, %v683_v30  ;;  %v515_v30 = vperm.slane %v483_v13, 1 }
  0x7b   : > { %v701_v39 = vpack.c.bf16 %v653_v33, %v651_v26  ;;  %v598_v26 = vadd.f32 %v514_v29, %v2304_v23  ;;  %v600_v33 = vadd.f32 %v514_v29, %v2306_v24 }
  0x7c   : > { %1215 = vmatpush.bf16.msra.mxu2 %v1932_v38 }
  0x7d   : > { %1964 = vmatpush.bf16.msra.mxu3 %v1932_v38  ;;  %v662_v42 = vmax.f32 %v598_v26, 0.0  ;;  %v664_v43 = vmax.f32 %v600_v33, 0.0 }
  0x87   : > { %879 = vmatmul.bf16.gmra.mxu0 %v696_v48  ;;  %1008 = vmatmul.bf16.gmra.mxu3 %v713_v46  ;;  %v656_v48 = vmax.f32 %v592_v44, 0.0  ;;  %v655_v46 = vmax.f32 %v591_v45, 0.0 }
  0x88   : > { %968 = vmatmul.bf16.gmra.mxu1 %v697_v51  ;;  %v480_v51 = vsel %vm458_vm2, %v2263_v10, %v2261_v9 }
  0x89   : > { %v702_v52 = vpack.c.bf16 %v656_v48, %v654_v47  ;;  %v481_v53 = vrot.slane %v480_v51, 1  ;;  %v703_v55 = vpack.c.bf16 %v657_v49, %v655_v46  ;;  %v484_v48 = vsel %vm464_vm6, %v2263_v10, %v2261_v9 }
  0x8a   : > { %v706_v51 = vpack.c.bf16 %v664_v43, %v662_v42 }
  0x8b   : > { %v512_v57 = vperm.slane %v481_v53, 0  ;;  %v513_v58 = vperm.slane %v481_v53, 1 }
  0x8d   : > { %v594_v60 = vadd.f32 %v512_v57, %v2304_v23  ;;  %v596_v61 = vadd.f32 %v512_v57, %v2306_v24  ;;  %v595_v62 = vadd.f32 %v513_v58, %v2314_v27  ;;  %v597_v1 = vadd.f32 %v513_v58, %v2316_v28 }
  0x8f   : > { %v659_v11 = vmax.f32 %v595_v62, 0.0 }
  0x97   : > { %884 = vmatmul.bf16.gmra.mxu0 %v698_v6  ;;  %1013 = vmatmul.bf16.gmra.mxu3 %v715_v7  ;;  %v658_v6 = vmax.f32 %v594_v60, 0.0  ;;  %v660_v7 = vmax.f32 %v596_v61, 0.0 }
  0x98   : > { %973 = vmatmul.bf16.gmra.mxu1 %v699_v18  ;;  %v661_v18 = vmax.f32 %v597_v1, 0.0 }
  0x99   : > { %v704_v21 = vpack.c.bf16 %v660_v7, %v658_v6 }
  0x9a   : > { %v705_v22 = vpack.c.bf16 %v661_v18, %v659_v11 }
  0xa7   : > { %889 = vmatmul.bf16.gmra.mxu0 %v700_v34  ;;  %1018 = vmatmul.bf16.gmra.mxu3 %v717_v35  ;;  %v599_v34 = vadd.f32 %v515_v30, %v2314_v27 }
  0xa8   : > { %978 = vmatmul.bf16.gmra.mxu1 %v701_v39  ;;  %v601_v39 = vadd.f32 %v515_v30, %v2316_v28 }
  0xa9   : > { %v663_v44 = vmax.f32 %v599_v34, 0.0 }
  0xaa   : > { %v665_v50 = vmax.f32 %v601_v39, 0.0 }
  0xb4   : > { %v855_v54 = vpop.f32.mrf.mxu0 }
  0xb5   : > { %v944_v56 = vpop.f32.mrf.mxu1 }
  0xb6   : > { %v945_v59 = vadd.f32 %v944_v56, %v855_v54  ;;  %v707_v54 = vpack.c.bf16 %v665_v50, %v663_v44 }
  0xb7   : > { %894 = vmatmul.bf16.gmra.mxu0 %v702_v52  ;;  %v485_v52 = vrot.slane %v484_v48, 3 }
  0xb8   : > { %983 = vmatmul.bf16.gmra.mxu1 %v703_v55  ;;  %v1028_v63 = vmul.f32 %v2483_v4, %v945_v59 }
  0xb9   : > { %v516_v59 = vperm.slane %v485_v52, 0  ;;  %v517_v61 = vperm.slane %v485_v52, 1 }
  0xba   : > { %v2485_v8 = vpop.f32.mrf.mxu3  ;;  %v1064_v20 = vadd.f32 %v2495_v2, %v1028_v63 }
  0xbb   : > { %v602_v9 = vadd.f32 %v516_v59, %v2304_v23  ;;  %v604_v10 = vadd.f32 %v516_v59, %v2306_v24  ;;  %v603_v1 = vadd.f32 %v517_v61, %v2314_v27 }
  0xbc   : > { %v857_v0 = vpop.f32.mrf.mxu0  ;;  %v1096_v37 = vmax.f32 %v1064_v20, 0.0 }
  0xbd   : > { %v946_v3 = vpop.f32.mrf.mxu1  ;;  %v666_v7 = vmax.f32 %v602_v9, 0.0  ;;  %v668_v11 = vmax.f32 %v604_v10, 0.0  ;;  %v667_v18 = vmax.f32 %v603_v1, 0.0 }
  0xbe   : > { %v947_v5 = vadd.f32 %v946_v3, %v857_v0  ;;  %v605_v3 = vadd.f32 %v517_v61, %v2316_v28 }
  0xc0   : > { %v1029_v17 = vmul.f32 %v2483_v4, %v947_v5  ;;  %v669_v20 = vmax.f32 %v605_v3, 0.0 }
  0xc2   : > { %v2502_v12 = vpop.f32.mrf.mxu3  ;;  %v1065_v15 = vadd.f32 %v2495_v2, %v1029_v17  ;;  %v709_v13 = vpack.c.bf16 %v669_v20, %v667_v18 }
  0xc4   : > { %v860_v16 = vpop.f32.mrf.mxu0  ;;  %v1097_v40 = vmax.f32 %v1065_v15, 0.0  ;;  %v708_v15 = vpack.c.bf16 %v668_v11, %v666_v7 }
  0xc5   : > { %v949_v25 = vpop.f32.mrf.mxu1 }
  0xc6   : > { %v1128_v19 = vpack.c.bf16 %v1097_v40, %v1096_v37  ;;  %v950_v31 = vadd.f32 %v949_v25, %v860_v16 }
  0xc7   : > { %899 = vmatmul.bf16.gmra.mxu0 %v704_v21 }
  0xc8   : > { %988 = vmatmul.bf16.gmra.mxu1 %v705_v22  ;;  %1216 = vmatmul.bf16.vlgmr.msra.gmra.mxu2 %v1128_v19  ;;  %v1030_v35 = vmul.f32 %v2483_v4, %v950_v31 }
  0xca   : > { %v2505_v32 = vpop.f32.mrf.mxu3  ;;  %v1066_v47 = vadd.f32 %v2495_v2, %v1030_v35 }
  0xcc   : > { %v862_v38 = vpop.f32.mrf.mxu0  ;;  %v1098_v55 = vmax.f32 %v1066_v47, 0.0 }
  0xcd   : > { %v951_v36 = vpop.f32.mrf.mxu1 }
  0xce   : > { %v952_v41 = vadd.f32 %v951_v36, %v862_v38 }
  0xd0   : > { %v1031_v45 = vmul.f32 %v2483_v4, %v952_v41 }
  0xd2   : > { %v2517_v46 = vpop.f32.mrf.mxu3  ;;  %v1067_v49 = vadd.f32 %v2495_v2, %v1031_v45 }
  0xd4   : > { %v865_v53 = vpop.f32.mrf.mxu0  ;;  %v1099_v56 = vmax.f32 %v1067_v49, 0.0 }
  0xd5   : > { %v954_v57 = vpop.f32.mrf.mxu1 }
  0xd6   : > { %v1129_v58 = vpack.c.bf16 %v1099_v56, %v1098_v55  ;;  %v955_v60 = vadd.f32 %v954_v57, %v865_v53 }
  0xd7   : > { %904 = vmatmul.bf16.gmra.mxu0 %v706_v51 }
  0xd8   : > { %993 = vmatmul.bf16.gmra.mxu1 %v707_v54  ;;  %1221 = vmatmul.bf16.gmra.mxu2 %v1129_v58  ;;  %v1032_v63 = vmul.f32 %v2483_v4, %v955_v60 }
  0xda   : > { %v2520_v62 = vpop.f32.mrf.mxu3  ;;  %v1068_v14 = vadd.f32 %v2495_v2, %v1032_v63 }
  0xdc   : > { %v867_v0 = vpop.f32.mrf.mxu0  ;;  %v1100_v27 = vmax.f32 %v1068_v14, 0.0 }
  0xdd   : > { %v956_v5 = vpop.f32.mrf.mxu1 }
  0xde   : > { %v957_v6 = vadd.f32 %v956_v5, %v867_v0 }
  0xe0   : > { %v1033_v17 = vmul.f32 %v2483_v4, %v957_v6 }
  0xe2   : > { %v2529_v23 = vpop.f32.mrf.mxu3  ;;  %v1069_v24 = vadd.f32 %v2495_v2, %v1033_v17 }
  0xe4   : > { %v870_v21 = vpop.f32.mrf.mxu0  ;;  %v1101_v16 = vmax.f32 %v1069_v24, 0.0 }
  0xe5   : > { %v959_v28 = vpop.f32.mrf.mxu1 }
  0xe6   : > { %v1130_v22 = vpack.c.bf16 %v1101_v16, %v1100_v27  ;;  %v960_v37 = vadd.f32 %v959_v28, %v870_v21 }
  0xe7   : > { %909 = vmatmul.bf16.gmra.mxu0 %v708_v15 }
  0xe8   : > { %998 = vmatmul.bf16.gmra.mxu1 %v709_v13  ;;  %1226 = vmatmul.bf16.gmra.mxu2 %v1130_v22  ;;  %v1034_v25 = vmul.f32 %v2483_v4, %v960_v37 }
  0xea   : > { %v2532_v40 = vpop.f32.mrf.mxu3  ;;  %v1070_v26 = vadd.f32 %v2495_v2, %v1034_v25 }
  0xec   : > { %v872_v19 = vpop.f32.mrf.mxu0  ;;  %v1102_v38 = vmax.f32 %v1070_v26, 0.0 }
  0xed   : > { %v961_v29 = vpop.f32.mrf.mxu1 }
  0xee   : > { %v962_v30 = vadd.f32 %v961_v29, %v872_v19  ;;  %v2027_v19 = vld [vmem:[#allocation2] ss:$0 sm:$0xff] }
  0xf0   : > { %v1035_v31 = vmul.f32 %v2483_v4, %v962_v30 }
  0xf2   : > { %v2537_v33 = vpop.f32.mrf.mxu3  ;;  %v1071_v34 = vadd.f32 %v2495_v2, %v1035_v31  ;;  %v2111_v31 = vmov 0  }
  0xf3   : > { %2023 = vset.pattern.permute.xlu1 %v2111_v31  ;;  %2024 = vset.pattern.permute.xlu0 %v2111_v31 }
  0xf4   : > { %v875_v35 = vpop.f32.mrf.mxu0  ;;  %v1103_v39 = vmax.f32 %v1071_v34, 0.0  ;;  %1538 = vperm.xlu1 %2023, %v2027_v19  }
  0xf5   : > { %v964_v36 = vpop.f32.mrf.mxu1 }
  0xf6   : > { %v1131_v41 = vpack.c.bf16 %v1103_v39, %v1102_v38  ;;  %v965_v42 = vadd.f32 %v964_v36, %v875_v35 }
  0xf8   : > { %1231 = vmatmul.bf16.gmra.mxu2 %v1131_v41  ;;  %v1036_v44 = vmul.f32 %v2483_v4, %v965_v42 }
  0xfa   : > { %v1004_v43 = vpop.f32.mrf.mxu3  ;;  %v1072_v51 = vadd.f32 %v2495_v2, %v1036_v44 }
  0xfb   : > { %v1005_v50 = vadd.f32 %v1004_v43, %v2485_v8 }
  0xfc   : > { %v877_v45 = vpop.f32.mrf.mxu0  ;;  %v1104_v57 = vmax.f32 %v1072_v51, 0.0 }
  0xfd   : > { %v966_v47 = vpop.f32.mrf.mxu1  ;;  %v1052_v52 = vmul.f32 %v2483_v4, %v1005_v50 }
  0xfe   : > { %v967_v48 = vadd.f32 %v966_v47, %v877_v45 }
  0xff   : > { %v1088_v59 = vadd.f32 %v2495_v2, %v1052_v52 }
 0x100   : > { %v1037_v49 = vmul.f32 %v2483_v4, %v967_v48 }
 0x101   : > { %v1120_v63 = vmax.f32 %v1088_v59, 0.0 }
 0x102   : > { %v1006_v53 = vpop.f32.mrf.mxu3  ;;  %v1073_v54 = vadd.f32 %v2495_v2, %v1037_v49 }
 0x103   : > { %v1007_v55 = vadd.f32 %v1006_v53, %v2502_v12 }
 0x104   : > { %v880_v56 = vpop.f32.mrf.mxu0  ;;  %v1105_v58 = vmax.f32 %v1073_v54, 0.0 }
 0x105   : > { %v1053_v8 = vmul.f32 %v2483_v4, %v1007_v55  ;;  %v969_v60 = vpop.f32.mrf.mxu1 }
 0x106   : > { %v1132_v61 = vpack.c.bf16 %v1105_v58, %v1104_v57  ;;  %v970_v10 = vadd.f32 %v969_v60, %v880_v56 }
 0x107   : > { %v1089_v9 = vadd.f32 %v2495_v2, %v1053_v8 }
 0x108   : > { %1236 = vmatmul.bf16.gmra.mxu2 %v1132_v61  ;;  %v1038_v5 = vmul.f32 %v2483_v4, %v970_v10 }
 0x109   : > { %v1121_v0 = vmax.f32 %v1089_v9, 0.0 }
 0x10a   : > { %v1009_v1 = vpop.f32.mrf.mxu3  ;;  %v1074_v18 = vadd.f32 %v2495_v2, %v1038_v5 }
 0x10b   : > { %v1140_v3 = vpack.c.bf16 %v1121_v0, %v1120_v63  ;;  %v1010_v6 = vadd.f32 %v1009_v1, %v2505_v32 }
 0x10c   : > { %v882_v12 = vpop.f32.mrf.mxu0  ;;  %v1106_v13 = vmax.f32 %v1074_v18, 0.0 }
 0x10d   : > { %v971_v7 = vpop.f32.mrf.mxu1  ;;  %1276 = vmatmul.bf16.vlgmr.msra.gmra.mxu3 %v1140_v3  ;;  %v1054_v20 = vmul.f32 %v2483_v4, %v1010_v6 }
 0x10e   : > { %v972_v11 = vadd.f32 %v971_v7, %v882_v12 }
 0x10f   : > { %v1090_v28 = vadd.f32 %v2495_v2, %v1054_v20 }
 0x110   : > { %v1039_v17 = vmul.f32 %v2483_v4, %v972_v11 }
 0x111   : > { %v1122_v29 = vmax.f32 %v1090_v28, 0.0 }
 0x112   : > { %v1011_v14 = vpop.f32.mrf.mxu3  ;;  %v1075_v24 = vadd.f32 %v2495_v2, %v1039_v17 }
 0x113   : > { %v1012_v15 = vadd.f32 %v1011_v14, %v2517_v46 }
 0x114   : > { %v885_v21 = vpop.f32.mrf.mxu0  ;;  %v1107_v27 = vmax.f32 %v1075_v24, 0.0 }
 0x115   : > { %v1055_v16 = vmul.f32 %v2483_v4, %v1012_v15  ;;  %v974_v32 = vpop.f32.mrf.mxu1 }
 0x116   : > { %v1133_v22 = vpack.c.bf16 %v1107_v27, %v1106_v13  ;;  %v975_v25 = vadd.f32 %v974_v32, %v885_v21 }
 0x117   : > { %v1091_v37 = vadd.f32 %v2495_v2, %v1055_v16 }
 0x118   : > { %1241 = vmatmul.bf16.gmra.mxu2 %v1133_v22  ;;  %v1040_v34 = vmul.f32 %v2483_v4, %v975_v25 }
 0x119   : > { %v1123_v30 = vmax.f32 %v1091_v37, 0.0 }
 0x11a   : > { %v1014_v46 = vpop.f32.mrf.mxu3  ;;  %v1076_v42 = vadd.f32 %v2495_v2, %v1040_v34 }
 0x11b   : > { %v1141_v26 = vpack.c.bf16 %v1123_v30, %v1122_v29  ;;  %v1015_v38 = vadd.f32 %v1014_v46, %v2520_v62  ;;  %v2587_v46 = vld [vmem:[%s2909_s6] ss:$0 sm:$0xff] }
 0x11c   : > { %v887_v35 = vpop.f32.mrf.mxu0  ;;  %v1108_v48 = vmax.f32 %v1076_v42, 0.0 }
 0x11d   : > { %v976_v39 = vpop.f32.mrf.mxu1  ;;  %1281 = vmatmul.bf16.gmra.mxu3 %v1141_v26  ;;  %v1056_v43 = vmul.f32 %v2483_v4, %v1015_v38  ;;  %v2592_v26 = vld [vmem:[%s2910_s7] ss:$0 sm:$0xff] }
 0x11e   : > { %v977_v36 = vadd.f32 %v976_v39, %v887_v35 }
 0x11f   : > { %v1092_v52 = vadd.f32 %v2495_v2, %v1056_v43  ;;  %v2600_v43 = vld [vmem:[%s2911_s8] ss:$0 sm:$0xff] }
 0x120   : > { %v1041_v41 = vmul.f32 %v2483_v4, %v977_v36 }
 0x121   : > { %v1124_v56 = vmax.f32 %v1092_v52, 0.0 }
 0x122   : > { %v1016_v44 = vpop.f32.mrf.mxu3  ;;  %v1077_v45 = vadd.f32 %v2495_v2, %v1041_v41 }
 0x123   : > { %v1017_v50 = vadd.f32 %v1016_v44, %v2529_v23 }
 0x124   : > { %v890_v47 = vpop.f32.mrf.mxu0  ;;  %v1109_v49 = vmax.f32 %v1077_v45, 0.0 }
 0x125   : > { %v1057_v51 = vmul.f32 %v2483_v4, %v1017_v50  ;;  %v979_v62 = vpop.f32.mrf.mxu1 }
 0x126   : > { %v1134_v53 = vpack.c.bf16 %v1109_v49, %v1108_v48  ;;  %v980_v55 = vadd.f32 %v979_v62, %v890_v47 }
 0x127   : > { %v1093_v54 = vadd.f32 %v2495_v2, %v1057_v51 }
 0x128   : > { %1246 = vmatmul.bf16.gmra.mxu2 %v1134_v53  ;;  %v1042_v8 = vmul.f32 %v2483_v4, %v980_v55 }
 0x129   : > { %v1125_v57 = vmax.f32 %v1093_v54, 0.0 }
 0x12a   : > { %v1019_v58 = vpop.f32.mrf.mxu3  ;;  %v1078_v63 = vadd.f32 %v2495_v2, %v1042_v8 }
 0x12b   : > { %v1142_v59 = vpack.c.bf16 %v1125_v57, %v1124_v56  ;;  %v1020_v60 = vadd.f32 %v1019_v58, %v2532_v40 }
 0x12c   : > { %v892_v23 = vpop.f32.mrf.mxu0  ;;  %v1110_v6 = vmax.f32 %v1078_v63, 0.0 }
 0x12d   : > { %v981_v61 = vpop.f32.mrf.mxu1  ;;  %1286 = vmatmul.bf16.gmra.mxu3 %v1142_v59  ;;  %v1058_v0 = vmul.f32 %v2483_v4, %v1020_v60 }
 0x12e   : > { %v982_v9 = vadd.f32 %v981_v61, %v892_v23 }
 0x12f   : > { %v1094_v17 = vadd.f32 %v2495_v2, %v1058_v0 }
 0x130   : > { %v1043_v10 = vmul.f32 %v2483_v4, %v982_v9 }
 0x131   : > { %v1126_v24 = vmax.f32 %v1094_v17, 0.0 }
 0x132   : > { %v1021_v1 = vpop.f32.mrf.mxu3  ;;  %v1079_v3 = vadd.f32 %v2495_v2, %v1043_v10 }
 0x133   : > { %v1022_v5 = vadd.f32 %v1021_v1, %v2537_v33 }
 0x134   : > { %v895_v12 = vpop.f32.mrf.mxu0  ;;  %v1111_v7 = vmax.f32 %v1079_v3, 0.0 }
 0x135   : > { %v1059_v11 = vmul.f32 %v2483_v4, %v1022_v5  ;;  %v984_v40 = vpop.f32.mrf.mxu1 }
 0x136   : > { %v1135_v18 = vpack.c.bf16 %v1111_v7, %v1110_v6  ;;  %v985_v14 = vadd.f32 %v984_v40, %v895_v12 }
 0x137   : > { %v1095_v20 = vadd.f32 %v2495_v2, %v1059_v11 }
 0x138   : > { %1251 = vmatmul.bf16.gmra.mxu2 %v1135_v18  ;;  %v1044_v13 = vmul.f32 %v2483_v4, %v985_v14 }
 0x139   : > { %v1127_v15 = vmax.f32 %v1095_v20, 0.0 }
 0x13a   : > { %v1080_v28 = vadd.f32 %v2495_v2, %v1044_v13 }
 0x13b   : > { %v1143_v21 = vpack.c.bf16 %v1127_v15, %v1126_v24 }
 0x13c   : > { %v897_v27 = vpop.f32.mrf.mxu0  ;;  %v1112_v25 = vmax.f32 %v1080_v28, 0.0 }
 0x13d   : > { %v986_v33 = vpop.f32.mrf.mxu1  ;;  %1291 = vmatmul.bf16.gmra.mxu3 %v1143_v21 }
 0x13e   : > { %v987_v16 = vadd.f32 %v986_v33, %v897_v27 }
 0x140   : > { %v1045_v32 = vmul.f32 %v2483_v4, %v987_v16 }
 0x142   : > { %v1081_v22 = vadd.f32 %v2495_v2, %v1045_v32 }
 0x144   : > { %v900_v37 = vpop.f32.mrf.mxu0  ;;  %v1113_v19 = vmax.f32 %v1081_v22, 0.0 }
 0x145   : > { %v989_v29 = vpop.f32.mrf.mxu1 }
 0x146   : > { %v1136_v30 = vpack.c.bf16 %v1113_v19, %v1112_v25  ;;  %v990_v31 = vadd.f32 %v989_v29, %v900_v37 }
 0x148   : > { %1256 = vmatmul.bf16.gmra.mxu2 %v1136_v30  ;;  %v1046_v35 = vmul.f32 %v2483_v4, %v990_v31 }
 0x14a   : > { %v1082_v50 = vadd.f32 %v2495_v2, %v1046_v35 }
 0x14b   : > { %v1217_v34 = vpop.f32.mrf.mxu2 }
 0x14c   : > { %v1301_v38 = vmul.f32 %v2587_v46, %v1217_v34  ;;  %v902_v39 = vpop.f32.mrf.mxu0  ;;  %v1114_v53 = vmax.f32 %v1082_v50, 0.0 }
 0x14d   : > { %v991_v36 = vpop.f32.mrf.mxu1 }
 0x14e   : > { %v1337_v41 = vadd.f32 %v2592_v26, %v1301_v38  ;;  %v992_v42 = vadd.f32 %v991_v36, %v902_v39 }
 0x150   : > { %v1369_v44 = vmax.f32 %v1337_v41, 0.0  ;;  %v1047_v45 = vmul.f32 %v2483_v4, %v992_v42 }
 0x152   : > { %v1405_v47 = vmul.f32 %v2600_v43, %v1369_v44  ;;  %v1083_v48 = vadd.f32 %v2495_v2, %v1047_v45 }
 0x153   : > { %v1219_v49 = vpop.f32.mrf.mxu2 }
 0x154   : > { %v1302_v51 = vmul.f32 %v2587_v46, %v1219_v49  ;;  %v1438_v62 = vsel %vm1437_vm8, %v1405_v47, 0.0  ;;  %v905_v52 = vpop.f32.mrf.mxu0  ;;  %v1115_v54 = vmax.f32 %v1083_v48, 0.0 }
 0x155   : > { %v994_v55 = vpop.f32.mrf.mxu1  ;;  %1439 = vadd.xlane.f32.xlu0 %v1438_v62 }
 0x156   : > { %v1338_v56 = vadd.f32 %v2592_v26, %v1302_v51  ;;  %v1137_v57 = vpack.c.bf16 %v1115_v54, %v1114_v53  ;;  %v995_v59 = vadd.f32 %v994_v55, %v905_v52 }
 0x158   : > { %v1370_v58 = vmax.f32 %v1338_v56, 0.0  ;;  %1261 = vmatmul.bf16.gmra.mxu2 %v1137_v57  ;;  %v1048_v60 = vmul.f32 %v2483_v4, %v995_v59 }
 0x15a   : > { %v1406_v8 = vmul.f32 %v2600_v43, %v1370_v58  ;;  %v1084_v12 = vadd.f32 %v2495_v2, %v1048_v60 }
 0x15b   : > { %v1222_v23 = vpop.f32.mrf.mxu2 }
 0x15c   : > { %v1303_v61 = vmul.f32 %v2587_v46, %v1222_v23  ;;  %v1441_v9 = vsel %vm1437_vm8, %v1406_v8, 0.0  ;;  %v907_v10 = vpop.f32.mrf.mxu0  ;;  %v1116_v20 = vmax.f32 %v1084_v12, 0.0 }
 0x15d   : > { %v996_v63 = vpop.f32.mrf.mxu1  ;;  %1442 = vadd.xlane.f32.xlu0 %v1441_v9 }
 0x15e   : > { %v1339_v0 = vadd.f32 %v2592_v26, %v1303_v61  ;;  %v997_v1 = vadd.f32 %v996_v63, %v907_v10 }
 0x160   : > { %v1371_v3 = vmax.f32 %v1339_v0, 0.0  ;;  %v1049_v5 = vmul.f32 %v2483_v4, %v997_v1 }
 0x162   : > { %v1407_v6 = vmul.f32 %v2600_v43, %v1371_v3  ;;  %v1085_v7 = vadd.f32 %v2495_v2, %v1049_v5 }
 0x163   : > { %v1224_v11 = vpop.f32.mrf.mxu2 }
 0x164   : > { %v1304_v40 = vmul.f32 %v2587_v46, %v1224_v11  ;;  %v1444_v17 = vsel %vm1437_vm8, %v1407_v6, 0.0  ;;  %v910_v18 = vpop.f32.mrf.mxu0  ;;  %v1117_v14 = vmax.f32 %v1085_v7, 0.0 }
 0x165   : > { %v999_v24 = vpop.f32.mrf.mxu1  ;;  %1445 = vadd.xlane.f32.xlu1 %v1444_v17 }
 0x166   : > { %v1340_v15 = vadd.f32 %v2592_v26, %v1304_v40  ;;  %v1138_v21 = vpack.c.bf16 %v1117_v14, %v1116_v20  ;;  %v1000_v27 = vadd.f32 %v999_v24, %v910_v18 }
 0x168   : > { %v1372_v13 = vmax.f32 %v1340_v15, 0.0  ;;  %1266 = vmatmul.bf16.gmra.mxu2 %v1138_v21  ;;  %v1050_v32 = vmul.f32 %v2483_v4, %v1000_v27 }
 0x16a   : > { %v1408_v33 = vmul.f32 %v2600_v43, %v1372_v13  ;;  %v1086_v34 = vadd.f32 %v2495_v2, %v1050_v32 }
 0x16b   : > { %v1227_v16 = vpop.f32.mrf.mxu2 }
 0x16c   : > { %v1305_v28 = vmul.f32 %v2587_v46, %v1227_v16  ;;  %v1447_v22 = vsel %vm1437_vm8, %v1408_v33, 0.0  ;;  %v912_v37 = vpop.f32.mrf.mxu0  ;;  %v1118_v42 = vmax.f32 %v1086_v34, 0.0 }
 0x16d   : > { %v1001_v25 = vpop.f32.mrf.mxu1  ;;  %1448 = vadd.xlane.f32.xlu1 %v1447_v22 }
 0x16e   : > { %v1341_v19 = vadd.f32 %v2592_v26, %v1305_v28  ;;  %v1002_v29 = vadd.f32 %v1001_v25, %v912_v37 }
 0x170   : > { %v1373_v30 = vmax.f32 %v1341_v19, 0.0  ;;  %v1051_v31 = vmul.f32 %v2483_v4, %v1002_v29 }
 0x172   : > { %v1409_v35 = vmul.f32 %v2600_v43, %v1373_v30  ;;  %v1087_v38 = vadd.f32 %v2495_v2, %v1051_v31 }
 0x173   : > { %v1229_v39 = vpop.f32.mrf.mxu2 }
 0x174   : > { %v1306_v36 = vmul.f32 %v2587_v46, %v1229_v39  ;;  %v1450_v41 = vsel %vm1437_vm8, %v1409_v35, 0.0  ;;  %v1119_v44 = vmax.f32 %v1087_v38, 0.0 }
 0x175   : > { %1451 = vadd.xlane.f32.xlu2 %v1450_v41 }
 0x176   : > { %v1342_v45 = vadd.f32 %v2592_v26, %v1306_v36  ;;  %v1139_v50 = vpack.c.bf16 %v1119_v44, %v1118_v42 }
 0x178   : > { %v1374_v47 = vmax.f32 %v1342_v45, 0.0  ;;  %1271 = vmatmul.bf16.gmra.mxu2 %v1139_v50 }
 0x17a   : > { %v1410_v4 = vmul.f32 %v2600_v43, %v1374_v47 }
 0x17b   : > { %v1232_v48 = vpop.f32.mrf.mxu2 }
 0x17c   : > { %v1307_v49 = vmul.f32 %v2587_v46, %v1232_v48  ;;  %v1453_v2 = vsel %vm1437_vm8, %v1410_v4, 0.0 }
 0x17d   : > { %1454 = vadd.xlane.f32.xlu2 %v1453_v2 }
 0x17e   : > { %v1343_v51 = vadd.f32 %v2592_v26, %v1307_v49 }
 0x180   : > { %v1375_v62 = vmax.f32 %v1343_v51, 0.0 }
 0x182   : > { %v1411_v52 = vmul.f32 %v2600_v43, %v1375_v62 }
 0x183   : > { %v1234_v53 = vpop.f32.mrf.mxu2 }
 0x184   : > { %v1308_v54 = vmul.f32 %v2587_v46, %v1234_v53  ;;  %v1456_v55 = vsel %vm1437_vm8, %v1411_v52, 0.0 }
 0x185   : > { %1457 = vadd.xlane.f32.xlu0 %v1456_v55 }
 0x186   : > { %v1344_v56 = vadd.f32 %v2592_v26, %v1308_v54 }
 0x188   : > { %v1376_v57 = vmax.f32 %v1344_v56, 0.0 }
 0x18a   : > { %v1412_v58 = vmul.f32 %v2600_v43, %v1376_v57 }
 0x18b   : > { %v1237_v59 = vpop.f32.mrf.mxu2 }
 0x18c   : > { %v1309_v8 = vmul.f32 %v2587_v46, %v1237_v59  ;;  %v1459_v23 = vsel %vm1437_vm8, %v1412_v58, 0.0 }
 0x18d   : > { %1460 = vadd.xlane.f32.xlu1 %v1459_v23 }
 0x18e   : > { %v1345_v60 = vadd.f32 %v2592_v26, %v1309_v8 }
 0x190   : > { %v1377_v61 = vmax.f32 %v1345_v60, 0.0  ;;  %v1277_v9 = vpop.f32.mrf.mxu3 }
 0x191   : > { %v1325_v10 = vmul.f32 %v2587_v46, %v1277_v9 }
 0x192   : > { %v1413_v63 = vmul.f32 %v2600_v43, %v1377_v61 }
 0x193   : > { %v1361_v0 = vadd.f32 %v2592_v26, %v1325_v10  ;;  %v1239_v1 = vpop.f32.mrf.mxu2 }
 0x194   : > { %v1310_v3 = vmul.f32 %v2587_v46, %v1239_v1  ;;  %v1462_v5 = vsel %vm1437_vm8, %v1413_v63, 0.0 }
 0x195   : > { %v1393_v12 = vmax.f32 %v1361_v0, 0.0  ;;  %1463 = vadd.xlane.f32.xlu2 %v1462_v5 }
 0x196   : > { %v1346_v6 = vadd.f32 %v2592_v26, %v1310_v3 }
 0x197   : > { %v1429_v40 = vmul.f32 %v2600_v43, %v1393_v12 }
 0x198   : > { %v1378_v7 = vmax.f32 %v1346_v6, 0.0  ;;  %v1279_v11 = vpop.f32.mrf.mxu3 }
 0x199   : > { %v1326_v17 = vmul.f32 %v2587_v46, %v1279_v11  ;;  %v1510_v15 = vsel %vm1437_vm8, %v1429_v40, 0.0 }
 0x19a   : > { %v1414_v18 = vmul.f32 %v2600_v43, %v1378_v7 }
 0x19b   : > { %v1362_v20 = vadd.f32 %v2592_v26, %v1326_v17  ;;  %v1242_v14 = vpop.f32.mrf.mxu2 }
 0x19c   : > { %v1311_v24 = vmul.f32 %v2587_v46, %v1242_v14  ;;  %v1465_v21 = vsel %vm1437_vm8, %v1414_v18, 0.0 }
 0x19d   : > { %v1394_v13 = vmax.f32 %v1362_v20, 0.0  ;;  %1511 = vadd.xlane.f32.xlu2 %v1510_v15  ;;  %1466 = vadd.xlane.f32.xlu0 %v1465_v21 }
 0x19e   : > { %v1347_v27 = vadd.f32 %v2592_v26, %v1311_v24 }
 0x19f   : > { %v1430_v32 = vmul.f32 %v2600_v43, %v1394_v13 }
 0x1a0   : > { %v1379_v33 = vmax.f32 %v1347_v27, 0.0  ;;  %v1282_v16 = vpop.f32.mrf.mxu3 }
 0x1a1   : > { %v1327_v28 = vmul.f32 %v2587_v46, %v1282_v16  ;;  %v1513_v29 = vsel %vm1437_vm8, %v1430_v32, 0.0 }
 0x1a2   : > { %v1415_v22 = vmul.f32 %v2600_v43, %v1379_v33 }
 0x1a3   : > { %v1363_v37 = vadd.f32 %v2592_v26, %v1327_v28  ;;  %v1244_v25 = vpop.f32.mrf.mxu2 }
 0x1a4   : > { %v1312_v19 = vmul.f32 %v2587_v46, %v1244_v25  ;;  %v1468_v30 = vsel %vm1437_vm8, %v1415_v22, 0.0 }
 0x1a5   : > { %v1395_v31 = vmax.f32 %v1363_v37, 0.0  ;;  %1514 = vadd.xlane.f32.xlu0 %v1513_v29  ;;  %1469 = vadd.xlane.f32.xlu1 %v1468_v30 }
 0x1a6   : > { %v1348_v34 = vadd.f32 %v2592_v26, %v1312_v19 }
 0x1a7   : > { %v1431_v35 = vmul.f32 %v2600_v43, %v1395_v31 }
 0x1a8   : > { %v1284_v38 = vpop.f32.mrf.mxu3  ;;  %v1380_v39 = vmax.f32 %v1348_v34, 0.0 }
 0x1a9   : > { %v1328_v36 = vmul.f32 %v2587_v46, %v1284_v38  ;;  %v1516_v41 = vsel %vm1437_vm8, %v1431_v35, 0.0 }
 0x1aa   : > { %1517 = vadd.xlane.f32.xlu2 %v1516_v41  ;;  %v1416_v47 = vmul.f32 %v2600_v43, %v1380_v39 }
 0x1ab   : > { %v1364_v42 = vadd.f32 %v2592_v26, %v1328_v36  ;;  %v1247_v44 = vpop.f32.mrf.mxu2 }
 0x1ac   : > { %v1313_v45 = vmul.f32 %v2587_v46, %v1247_v44  ;;  %v1471_v52 = vsel %vm1437_vm8, %v1416_v47, 0.0 }
 0x1ad   : > { %v1396_v50 = vmax.f32 %v1364_v42, 0.0 }
 0x1ae   : > { %v1349_v4 = vadd.f32 %v2592_v26, %v1313_v45 }
 0x1af   : > { %v1432_v48 = vmul.f32 %v2600_v43, %v1396_v50 }
 0x1b0   : > { %v1287_v49 = vpop.f32.mrf.mxu3  ;;  %v1381_v2 = vmax.f32 %v1349_v4, 0.0 }
 0x1b1   : > { %v1329_v51 = vmul.f32 %v2587_v46, %v1287_v49  ;;  %v1519_v62 = vsel %vm1437_vm8, %v1432_v48, 0.0 }
 0x1b2   : > { %1520 = vadd.xlane.f32.xlu0 %v1519_v62  ;;  %1472 = vadd.xlane.f32.xlu2 %v1471_v52  ;;  %v1417_v57 = vmul.f32 %v2600_v43, %v1381_v2 }
 0x1b3   : > { %v1365_v53 = vadd.f32 %v2592_v26, %v1329_v51  ;;  %v1249_v54 = vpop.f32.mrf.mxu2 }
 0x1b4   : > { %v1314_v55 = vmul.f32 %v2587_v46, %v1249_v54  ;;  %v1474_v60 = vsel %vm1437_vm8, %v1417_v57, 0.0 }
 0x1b5   : > { %v1397_v56 = vmax.f32 %v1365_v53, 0.0 }
 0x1b6   : > { %v1350_v58 = vadd.f32 %v2592_v26, %v1314_v55 }
 0x1b7   : > { %v1433_v59 = vmul.f32 %v2600_v43, %v1397_v56 }
 0x1b8   : > { %v1382_v8 = vmax.f32 %v1350_v58, 0.0  ;;  %v1289_v29 = vpop.f32.mrf.mxu3 }
 0x1b9   : > { %v1522_v23 = vsel %vm1437_vm8, %v1433_v59, 0.0  ;;  %v1330_v34 = vmul.f32 %v2587_v46, %v1289_v29 }
 0x1ba   : > { %1523 = vadd.xlane.f32.xlu2 %v1522_v23  ;;  %1475 = vadd.xlane.f32.xlu0 %v1474_v60  ;;  %v1418_v61 = vmul.f32 %v2600_v43, %v1382_v8 }
 0x1bb   : > { %v1252_v9 = vpop.f32.mrf.mxu2  ;;  %v1366_v36 = vadd.f32 %v2592_v26, %v1330_v34 }
 0x1bc   : > { %v1315_v10 = vmul.f32 %v2587_v46, %v1252_v9  ;;  %v1477_v63 = vsel %vm1437_vm8, %v1418_v61, 0.0 }
 0x1bd   : > { %1478 = vadd.xlane.f32.xlu1 %v1477_v63  ;;  %v1398_v45 = vmax.f32 %v1366_v36, 0.0 }
 0x1be   : > { %v1351_v0 = vadd.f32 %v2592_v26, %v1315_v10 }
 0x1bf   : > { %v1434_v2 = vmul.f32 %v2600_v43, %v1398_v45 }
 0x1c0   : > { %v1383_v1 = vmax.f32 %v1351_v0, 0.0  ;;  %v1292_v48 = vpop.f32.mrf.mxu3 }
 0x1c1   : > { %v1525_v53 = vsel %vm1437_vm8, %v1434_v2, 0.0 }
 0x1c2   : > { %v1419_v3 = vmul.f32 %v2600_v43, %v1383_v1 }
 0x1c3   : > { %v1254_v5 = vpop.f32.mrf.mxu2 }
 0x1c4   : > { %v1316_v12 = vmul.f32 %v2587_v46, %v1254_v5  ;;  %v1480_v6 = vsel %vm1437_vm8, %v1419_v3, 0.0 }
 0x1c5   : > { %1481 = vadd.xlane.f32.xlu2 %v1480_v6  ;;  %v1331_v6 = vmul.f32 %v2587_v46, %v1292_v48 }
 0x1c6   : > { %v1352_v7 = vadd.f32 %v2592_v26, %v1316_v12 }
 0x1c8   : > { %v1384_v11 = vmax.f32 %v1352_v7, 0.0  ;;  %v2720_v55 = vpop.xlane.xlu0 %1439  ;;  %v1294_v59 = vpop.f32.mrf.mxu3 }
 0x1c9   : > { %v1332_v60 = vmul.f32 %v2587_v46, %v1294_v59 }
 0x1ca   : > { %v1420_v40 = vmul.f32 %v2600_v43, %v1384_v11 }
 0x1cb   : > { %v1257_v17 = vpop.f32.mrf.mxu2  ;;  %v1368_v63 = vadd.f32 %v2592_v26, %v1332_v60 }
 0x1cc   : > { %v1317_v18 = vmul.f32 %v2587_v46, %v1257_v17  ;;  %v1483_v20 = vsel %vm1437_vm8, %v1420_v40, 0.0 }
 0x1cd   : > { %1484 = vadd.xlane.f32.xlu0 %v1483_v20  ;;  %v1400_v7 = vmax.f32 %v1368_v63, 0.0 }
 0x1ce   : > { %v1353_v14 = vadd.f32 %v2592_v26, %v1317_v18  ;;  %v1367_v18 = vadd.f32 %v2592_v26, %v1331_v6 }
 0x1d0   : > { %v1385_v24 = vmax.f32 %v1353_v14, 0.0  ;;  %v1443_v0 = vpop.xlane.xlu0 %1442 }
 0x1d2   : > { %v1421_v15 = vmul.f32 %v2600_v43, %v1385_v24  ;;  %v1436_v24 = vmul.f32 %v2600_v43, %v1400_v7 }
 0x1d3   : > { %v1259_v21 = vpop.f32.mrf.mxu2 }
 0x1d4   : > { %v1318_v13 = vmul.f32 %v2587_v46, %v1259_v21  ;;  %v1486_v27 = vsel %vm1437_vm8, %v1421_v15, 0.0 }
 0x1d5   : > { %1487 = vadd.xlane.f32.xlu1 %v1486_v27  ;;  %v1531_v27 = vsel %vm1437_vm8, %v1436_v24, 0.0 }
 0x1d6   : > { %v1354_v33 = vadd.f32 %v2592_v26, %v1318_v13  ;;  %v1399_v13 = vmax.f32 %v1367_v18, 0.0 }
 0x1d8   : > { %v1386_v16 = vmax.f32 %v1354_v33, 0.0 }
 0x1da   : > { %v1422_v32 = vmul.f32 %v2600_v43, %v1386_v16 }
 0x1db   : > { %v1262_v28 = vpop.f32.mrf.mxu2 }
 0x1dc   : > { %v1319_v22 = vmul.f32 %v2587_v46, %v1262_v28  ;;  %v1489_v37 = vsel %vm1437_vm8, %v1422_v32, 0.0  ;;  %v1435_v32 = vmul.f32 %v2600_v43, %v1399_v13 }
 0x1dd   : > { %1490 = vadd.xlane.f32.xlu2 %v1489_v37 }
 0x1de   : > { %v1355_v25 = vadd.f32 %v2592_v26, %v1319_v22  ;;  %v1528_v22 = vsel %vm1437_vm8, %v1435_v32, 0.0 }
 0x1e0   : > { %v1387_v19 = vmax.f32 %v1355_v25, 0.0 }
 0x1e2   : > { %v1423_v30 = vmul.f32 %v2600_v43, %v1387_v19 }
 0x1e3   : > { %v1264_v31 = vpop.f32.mrf.mxu2 }
 0x1e4   : > { %v1320_v35 = vmul.f32 %v2587_v46, %v1264_v31  ;;  %v1492_v38 = vsel %vm1437_vm8, %v1423_v30, 0.0 }
 0x1e5   : > { %1493 = vadd.xlane.f32.xlu0 %v1492_v38 }
 0x1e6   : > { %v1356_v39 = vadd.f32 %v2592_v26, %v1320_v35 }
 0x1e8   : > { %v1388_v41 = vmax.f32 %v1356_v39, 0.0  ;;  %v2723_v57 = vpop.xlane.xlu2 %1451 }
 0x1ea   : > { %v1424_v42 = vmul.f32 %v2600_v43, %v1388_v41 }
 0x1eb   : > { %v1267_v44 = vpop.f32.mrf.mxu2 }
 0x1ec   : > { %v1321_v50 = vmul.f32 %v2587_v46, %v1267_v44  ;;  %v1495_v47 = vsel %vm1437_vm8, %v1424_v42, 0.0 }
 0x1ed   : > { %1496 = vadd.xlane.f32.xlu1 %v1495_v47 }
 0x1ee   : > { %v1357_v4 = vadd.f32 %v2592_v26, %v1321_v50 }
 0x1f0   : > { %v1389_v49 = vmax.f32 %v1357_v4, 0.0  ;;  %v1455_v3 = vpop.xlane.xlu2 %1454 }
 0x1f2   : > { %v1425_v51 = vmul.f32 %v2600_v43, %v1389_v49 }
 0x1f3   : > { %v1269_v62 = vpop.f32.mrf.mxu2 }
 0x1f4   : > { %v1322_v52 = vmul.f32 %v2587_v46, %v1269_v62  ;;  %v1498_v54 = vsel %vm1437_vm8, %v1425_v51, 0.0 }
 0x1f5   : > { %1526 = vadd.xlane.f32.xlu1 %v1525_v53  ;;  %1499 = vadd.xlane.f32.xlu2 %v1498_v54 }
 0x1f6   : > { %v1358_v56 = vadd.f32 %v2592_v26, %v1322_v52 }
 0x1f8   : > { %v1390_v58 = vmax.f32 %v1358_v56, 0.0  ;;  %v1458_v20 = vpop.xlane.xlu0 %1457 }
 0x1fa   : > { %v1426_v8 = vmul.f32 %v2600_v43, %v1390_v58 }
 0x1fb   : > { %v1272_v23 = vpop.f32.mrf.mxu2 }
 0x1fc   : > { %v1323_v61 = vmul.f32 %v2587_v46, %v1272_v23  ;;  %v1501_v9 = vsel %vm1437_vm8, %v1426_v8, 0.0 }
 0x1fd   : > { %1502 = vadd.xlane.f32.xlu0 %v1501_v9 }
 0x1fe   : > { %v1359_v10 = vadd.f32 %v2592_v26, %v1323_v61 }
 0x200   : > { %v1391_v1 = vmax.f32 %v1359_v10, 0.0 }
 0x202   : > { %v1427_v5 = vmul.f32 %v2600_v43, %v1391_v1 }
 0x203   : > { %v1274_v12 = vpop.f32.mrf.mxu2 }
 0x204   : > { %v1324_v11 = vmul.f32 %v2587_v46, %v1274_v12  ;;  %v1504_v40 = vsel %vm1437_vm8, %v1427_v5, 0.0  ;;  %v2741_v46 = vpop.permute.xlu1 %1538 }
 0x205   : > { %1505 = vadd.xlane.f32.xlu2 %v1504_v40  ;;  %v1546_v51 = vadd.f32 %v2741_v46, %v1455_v3  ;;  %v1542_v62 = vadd.f32 %v2741_v46, %v1443_v0  ;;  %v1545_v56 = vadd.f32 %v2741_v46, %v2723_v57  ;;  %v1541_v8 = vadd.f32 %v2741_v46, %v2720_v55 }
 0x206   : > { %v1360_v17 = vadd.f32 %v2592_v26, %v1324_v11  ;;  %v1605_v26 = vlaneseq  ;;  %v1547_v60 = vadd.f32 %v2741_v46, %v1458_v20 }
 0x208   : > { %v1392_v14 = vmax.f32 %v1360_v17, 0.0  ;;  %v1464_v15 = vpop.xlane.xlu2 %1463  ;;  %v2745_v25 = vand.u32 127, %v1605_v26 }
 0x209   : > { %v1549_v10 = vadd.f32 %v2741_v46, %v1464_v15 }
 0x20a   : > { %v1428_v21 = vmul.f32 %v2600_v43, %v1392_v14  ;;  %v2749_v30 = vadd.s32 4294967288, %v2745_v25  ;;  %v1615_v3 = vperm.slane %v1545_v56, %v2745_v25  ;;  %v1607_v7 = vperm.slane %v1541_v8, %v2745_v25 }
 0x20b   : > { %v1618_v40 = vperm.slane %v1547_v60, %v2745_v25  ;;  %v1621_v20 = vperm.slane %v1549_v10, %v2745_v25 }
 0x20c   : > { %v1507_v33 = vsel %vm1437_vm8, %v1428_v21, 0.0  ;;  %v1446_v37 = vpop.xlane.xlu1 %1445  ;;  %v1616_v9 = vperm.slane %v1546_v51, %v2749_v30  ;;  %v1609_v57 = vperm.slane %v1542_v62, %v2749_v30 }
 0x20d   : > { %1532 = vadd.xlane.f32.xlu2 %v1531_v27  ;;  %1508 = vadd.xlane.f32.xlu0 %v1507_v33  ;;  %v1543_v52 = vadd.f32 %v2741_v46, %v1446_v37 }
 0x20e   : > { %v1617_v18 = vsel %vm1610_vm9, %v1616_v9, %v1615_v3  ;;  %v1611_v24 = vsel %vm1610_vm9, %v1609_v57, %v1607_v7 }
 0x20f   : > { %v1612_v0 = vperm.slane %v1543_v52, %v2745_v25 }
 0x210   : > { %v1467_v16 = vpop.xlane.xlu0 %1466  ;;  %v1512_v28 = vpop.xlane.xlu2 %1511 }
 0x211   : > { %v1565_v19 = vadd.f32 %v2741_v46, %v1512_v28  ;;  %v1550_v58 = vadd.f32 %v2741_v46, %v1467_v16 }
 0x213   : > { %v1645_v34 = vperm.slane %v1565_v19, %v2745_v25  ;;  %v1622_v5 = vperm.slane %v1550_v58, %v2749_v30 }
 0x214   : > { %v1449_v38 = vpop.xlane.xlu1 %1448 }
 0x215   : > { %1529 = vadd.xlane.f32.xlu0 %v1528_v22  ;;  %v1544_v2 = vadd.f32 %v2741_v46, %v1449_v38  ;;  %v1623_v33 = vsel %vm1610_vm9, %v1622_v5, %v1621_v20 }
 0x217   : > { %v1613_v23 = vperm.slane %v1544_v2, %v2749_v30 }
 0x218   : > { %v1515_v29 = vpop.xlane.xlu0 %1514 }
 0x219   : > { %v1566_v31 = vadd.f32 %v2741_v46, %v1515_v29  ;;  %v1614_v11 = vsel %vm1610_vm9, %v1613_v23, %v1612_v0 }
 0x21a   : > { %v1657_v27 = vsel %vm458_vm2, %v1614_v11, %v1611_v24 }
 0x21b   : > { %v1646_v43 = vperm.slane %v1566_v31, %v2749_v30  ;;  %v1658_v26 = vsel %vm461_vm4, %v1617_v18, %v1657_v27 }
 0x21c   : > { %v1461_v44 = vpop.xlane.xlu1 %1460 }
 0x21d   : > { %v2755_v35 = vsel %vm1610_vm9, %v1646_v43, %v1645_v34  ;;  %v1518_v39 = vpop.xlane.xlu2 %1517  ;;  %v1548_v53 = vadd.f32 %v2741_v46, %v1461_v44 }
 0x21e   : > { %v1567_v36 = vadd.f32 %v2741_v46, %v1518_v39 }
 0x21f   : > { %v1619_v1 = vperm.slane %v1548_v53, %v2749_v30 }
 0x220   : > { %v1648_v45 = vperm.slane %v1567_v36, %v2745_v25 }
 0x221   : > { %v1620_v15 = vsel %vm1610_vm9, %v1619_v1, %v1618_v40 }
 0x222   : > { %v1659_v37 = vsel %vm464_vm6, %v1620_v15, %v1658_v26 }
 0x223   : > { %v1660_v29 = vsel %vm467_vm0, %v1623_v33, %v1659_v37 }
 0x224   : > { %v1470_v48 = vpop.xlane.xlu1 %1469 }
 0x225   : > { %v1521_v41 = vpop.xlane.xlu0 %1520  ;;  %v1473_v4 = vpop.xlane.xlu2 %1472  ;;  %v1551_v55 = vadd.f32 %v2741_v46, %v1470_v48 }
 0x226   : > { %v1568_v42 = vadd.f32 %v2741_v46, %v1521_v41  ;;  %v1552_v61 = vadd.f32 %v2741_v46, %v1473_v4 }
 0x227   : > { %v1624_v21 = vperm.slane %v1551_v55, %v2745_v25 }
 0x228   : > { %v1649_v50 = vperm.slane %v1568_v42, %v2749_v30  ;;  %v1625_v17 = vperm.slane %v1552_v61, %v2749_v30 }
 0x22a   : > { %v2762_v47 = vsel %vm1610_vm9, %v1649_v50, %v1648_v45  ;;  %v1626_v28 = vsel %vm1610_vm9, %v1625_v17, %v1624_v21 }
 0x22b   : > { %v1661_v43 = vsel %vm470_vm3, %v1626_v28, %v1660_v29 }
 0x22d   : > { %v2764_v49 = vpop.xlane.xlu2 %1523  ;;  %v1476_v59 = vpop.xlane.xlu0 %1475 }
 0x22e   : > { %v1553_v12 = vadd.f32 %v2741_v46, %v1476_v59  ;;  %v1569_v1 = vadd.f32 %v2741_v46, %v2764_v49 }
 0x230   : > { %v1479_v54 = vpop.xlane.xlu1 %1478  ;;  %v1627_v16 = vperm.slane %v1553_v12, %v2745_v25  ;;  %v1651_v49 = vperm.slane %v1569_v1, %v2745_v25 }
 0x231   : > { %v1554_v63 = vadd.f32 %v2741_v46, %v1479_v54 }
 0x233   : > { %v1628_v14 = vperm.slane %v1554_v63, %v2749_v30 }
 0x235   : > { %v1629_v19 = vsel %vm1610_vm9, %v1628_v14, %v1627_v16 }
 0x236   : > { %v1662_v38 = vsel %vm473_vm5, %v1629_v19, %v1661_v43 }
 0x238   : > { %v1482_v6 = vpop.xlane.xlu2 %1481 }
 0x239   : > { %v1555_v13 = vadd.f32 %v2741_v46, %v1482_v6 }
 0x23b   : > { %v1630_v31 = vperm.slane %v1555_v13, %v2745_v25 }
 0x240   : > { %v1485_v32 = vpop.xlane.xlu0 %1484 }
 0x241   : > { %v1556_v22 = vadd.f32 %v2741_v46, %v1485_v32 }
 0x243   : > { %v1631_v34 = vperm.slane %v1556_v22, %v2749_v30 }
 0x245   : > { %v1632_v39 = vsel %vm1610_vm9, %v1631_v34, %v1630_v31 }
 0x246   : > { %v1664_v36 = vsel %vm1663_vm10, %v1632_v39, %v1662_v38 }
 0x247   : > { %1675 = vst.msk [vmem:[%s2818_s12] sm:$0xff] %vm1674_vm11, %v1664_v36 }
 0x248   : > { %v1488_v42 = vpop.xlane.xlu1 %1487 }
 0x249   : > { %v1557_v54 = vadd.f32 %v2741_v46, %v1488_v42 }
 0x24b   : > { %v1633_v63 = vperm.slane %v1557_v54, %v2745_v25 }
 0x250   : > { %v1491_v41 = vpop.xlane.xlu2 %1490 }
 0x251   : > { %v1558_v62 = vadd.f32 %v2741_v46, %v1491_v41 }
 0x253   : > { %v1634_v8 = vperm.slane %v1558_v62, %v2749_v30 }
 0x255   : > { %v1635_v3 = vsel %vm1610_vm9, %v1634_v8, %v1633_v63 }
 0x258   : > { %v1494_v44 = vpop.xlane.xlu0 %1493 }
 0x259   : > { %v1559_v52 = vadd.f32 %v2741_v46, %v1494_v44 }
 0x25b   : > { %v1636_v23 = vperm.slane %v1559_v52, %v2745_v25 }
 0x260   : > { %v1497_v50 = vpop.xlane.xlu1 %1496 }
 0x261   : > { %v1560_v48 = vadd.f32 %v2741_v46, %v1497_v50 }
 0x263   : > { %v1637_v56 = vperm.slane %v1560_v48, %v2749_v30 }
 0x265   : > { %v1638_v57 = vsel %vm1610_vm9, %v1637_v56, %v1636_v23 }
 0x266   : > { %v1665_v6 = vsel %vm458_vm2, %v1638_v57, %v1635_v3 }
 0x268   : > { %v1500_v45 = vpop.xlane.xlu2 %1499  ;;  %v1527_v58 = vpop.xlane.xlu1 %1526 }
 0x269   : > { %v1561_v53 = vadd.f32 %v2741_v46, %v1500_v45  ;;  %v1570_v61 = vadd.f32 %v2741_v46, %v1527_v58 }
 0x26b   : > { %v1639_v9 = vperm.slane %v1561_v53, %v2745_v25  ;;  %v1652_v7 = vperm.slane %v1570_v61, %v2749_v30 }
 0x26d   : > { %v1653_v24 = vsel %vm1610_vm9, %v1652_v7, %v1651_v49 }
 0x270   : > { %v1503_v4 = vpop.xlane.xlu0 %1502 }
 0x271   : > { %v1562_v2 = vadd.f32 %v2741_v46, %v1503_v4 }
 0x273   : > { %v1640_v59 = vperm.slane %v1562_v2, %v2749_v30 }
 0x275   : > { %v1641_v55 = vsel %vm1610_vm9, %v1640_v59, %v1639_v9 }
 0x276   : > { %v1666_v40 = vsel %vm461_vm4, %v1641_v55, %v1665_v6 }
 0x278   : > { %v1506_v51 = vpop.xlane.xlu2 %1505 }
 0x279   : > { %v1563_v60 = vadd.f32 %v2741_v46, %v1506_v51 }
 0x27b   : > { %v1642_v5 = vperm.slane %v1563_v60, %v2745_v25 }
 0x280   : > { %v1509_v10 = vpop.xlane.xlu0 %1508  ;;  %v1533_v11 = vpop.xlane.xlu2 %1532 }
 0x281   : > { %v1564_v0 = vadd.f32 %v2741_v46, %v1509_v10  ;;  %v1572_v20 = vadd.f32 %v2741_v46, %v1533_v11 }
 0x283   : > { %v1643_v12 = vperm.slane %v1564_v0, %v2749_v30  ;;  %v1655_v33 = vperm.slane %v1572_v20, %v2749_v30 }
 0x285   : > { %v1644_v17 = vsel %vm1610_vm9, %v1643_v12, %v1642_v5 }
 0x286   : > { %v1667_v18 = vsel %vm464_vm6, %v1644_v17, %v1666_v40 }
 0x287   : > { %v1668_v14 = vsel %vm467_vm0, %v2755_v35, %v1667_v18 }
 0x288   : > { %v1669_v15 = vsel %vm470_vm3, %v2762_v47, %v1668_v14  ;;  %v1530_v21 = vpop.xlane.xlu0 %1529 }
 0x289   : > { %v1670_v13 = vsel %vm473_vm5, %v1653_v24, %v1669_v15  ;;  %v1571_v27 = vadd.f32 %v2741_v46, %v1530_v21 }
 0x28b   : > { %v1654_v16 = vperm.slane %v1571_v27, %v2745_v25 }
 0x28d   : > { %v1656_v35 = vsel %vm1610_vm9, %v1655_v33, %v1654_v16 }
 0x28e   : > { %v1671_v32 = vsel %vm1663_vm10, %v1656_v35, %v1670_v13 }
 0x28f   : > { %1676 = vst.msk [vmem:[%s2818_s12 + $0x8] sm:$0xff] %vm1674_vm11, %v1671_v32 }
 0x290   : > { %2058 = shalt.err (!%p2055_p5)
}
 0x291   : > { %s2112_s30 = smov 128   ;;  %s2113_s12 = smov 8  }
 0x292   : > { %1965 = dma.vmem_to_hbm [thread:$0]  (%p2212_p4), %s1694_s18, 256, %s1696_s21, %s1678_s25, %s2112_s30, %s2112_s30, %s2113_s12  }
 0x293 PF: > { %p1971_p6 = scmp.ge.s32.totalorder %s2109_s20, 2  ;;  %s1710_s11 = sand.u32 1, %s2089_s15  }
 0x294   : > { %s1711_s29 = scalar_lea.sflag [#allocation4], %s1710_s11 }
 0x295   : > { %p1968_p7 = pnand %p1971_p6, %p2219_p8 }
 0x297   : > { %p1969_p9 = pneg %p1968_p7 }
 0x299   : > { %2084 = dma.done.wait (%p1969_p9), %s1711_s29, 256  }
 0x29a   : > { %2086 = vsyncadd (%p1969_p9), %s1711_s29, 4294967040  ;;  %s25_s20 = sadd.s32 1, %s2109_s20   ;;  %s2916_s15 = smov %s2093_s16 }
 0x29b   : > { %p22_p10 = scmp.ge.s32.totalorder %s25_s20, 4   ;;  %s2917_s16 = smov %s2097_s17 }
 0x29c   : > { %s2918_s17 = smov %s2225_s27  ;;  %s2919_s18 = smov %s2105_s19 }
 0x29d   : > { %s2920_s19 = smov %s2922_s22  ;;  %24 = sbr.rel (!%p22_p10) target bundleno = 7 (0x7), region = 98 }
 0x2a2   :  { %1717 = vsyncpa [#allocation4], 1 }
 0x2a3   :  { %1719 = vsyncpa [#allocation4 + $0x1], 1 }

</bundles_post_ra>
